<compile_context>
chip_gen: v7x
topology: tpu7x:2x2x1
jax: 0.10.0
libtpu: 0.0.40
codegen_flags: <defaults>
</compile_context>

<pallas_src>
import functools

import jax
import jax.numpy as jnp
from jax import lax
from jax.experimental import pallas as pl
from jax.experimental.pallas import tpu as pltpu

KSIZE = 7
PAD = 3  # padding = 3 for kernel_size 7 (same-size output)


def _spatial_attention_kernel(x_ref, w_ref, o_ref, sum_ref, max_ref, *, C, H, W):
    # x_ref   : VMEM (1, Ct, H*W)   lane-dense channel tile of this batch element
    # w_ref   : SMEM (2, 49)        flattened conv weight (in-ch, kh*kw), f32
    # o_ref   : VMEM (1, 1, H*W)    output tile (written only at the last C step)
    # sum_ref : VMEM (1, H*W) f32   running channel sum
    # max_ref : VMEM (1, H*W) f32   running channel max
    c_step = pl.program_id(1)
    hw = H * W
    ct = x_ref.shape[1]

    @pl.when(c_step == 0)
    def _init():
        sum_ref[...] = jnp.zeros_like(sum_ref)
        max_ref[...] = jnp.full_like(max_ref, -jnp.inf)

    x = x_ref[0]                                              # (Ct, H*W), native dtype
    # Channel sum on the MXU (ones-vector dot, f32 accumulate): avoids
    # materializing an f32 copy of the tile and keeps the VPU free for the max.
    ones = jnp.ones((1, ct), x.dtype)
    sum_ref[...] += jnp.dot(ones, x, preferred_element_type=jnp.float32)
    max_ref[...] = jnp.maximum(
        max_ref[...], jnp.max(x, axis=0, keepdims=True).astype(jnp.float32))

    @pl.when(c_step == pl.num_programs(1) - 1)
    def _finalize():
        avg = sum_ref[...] * jnp.float32(1.0 / C)             # (1, H*W) f32
        mx = max_ref[...]                                     # (1, H*W) f32
        feat = jnp.concatenate([avg, mx], axis=0)             # (2, H*W) f32

        # Flat-pixel ids.  Row validity only needs comparisons against ids;
        # column validity needs col = ids mod W (shift/mask when W is pow2).
        ids = lax.broadcasted_iota(jnp.int32, (1, hw), 1)
        if (W & (W - 1)) == 0:
            col = ids & (W - 1)
        else:
            col = ids % W

        # Stage 1: 7 column shifts of the stacked (avg, max) map; each shift
        # moves both channels at once and is pre-masked with column validity
        # (which also kills the circular wrap of the roll).  6 rolls + 7 selects.
        col_taps = []
        for kj in range(KSIZE):
            dj = kj - PAD
            t = feat if dj == 0 else jnp.roll(feat, -dj, axis=1)
            ok = (col >= -dj) & (col < W - dj)
            col_taps.append(jnp.where(ok, t, 0.0))

        # Stage 2: per-row-offset weighted inner sums (scalar*vector FMAs on
        # the VPU), then 7 row shifts of +/- di*W masked with row validity.
        # 6 rolls + 7 selects.  Total ~12 rolls + 14 selects.
        acc = jnp.zeros((1, hw), jnp.float32)
        for ki in range(KSIZE):
            di = ki - PAD
            inner = jnp.zeros((1, hw), jnp.float32)
            for kj in range(KSIZE):
                t = col_taps[kj]
                idx = ki * KSIZE + kj
                inner = inner + (w_ref[0, idx] * t[0:1] + w_ref[1, idx] * t[1:2])
            shifted = inner if di == 0 else jnp.roll(inner, -di * W, axis=1)
            row_ok = (ids >= -di * W) & (ids < hw - di * W)
            acc = acc + jnp.where(row_ok, shifted, 0.0)

        o_ref[...] = jax.nn.sigmoid(acc).reshape(1, 1, hw).astype(o_ref.dtype)


def _vmem_budget_bytes():
    """~3/4 of this generation's physical VMEM (96 MiB on v5e/v6e, 48 MiB on v7x)."""
    try:
        phys = int(pltpu.get_tpu_info().vmem_capacity_bytes)
    except Exception:
        phys = 64 << 20  # most conservative current part (v7x, per TensorCore)
    return min((phys * 3) // 4, 96 << 20)


def _pick_c_tile(C, hw, dtype, target_bytes):
    """Largest channel tile that divides C, is sublane/packing aligned, and keeps
    the (1, Ct, H*W) input block under target_bytes."""
    itemsize = jnp.dtype(dtype).itemsize
    step = 8 * max(1, 4 // itemsize)        # 8 for f32, 16 for bf16, 32 for int8/fp8
    max_ct = max(1, target_bytes // (hw * itemsize))
    if C <= max_ct:
        return C
    best = None
    ct = step
    while ct <= max_ct:
        if C % ct == 0:
            best = ct
        ct += step
    if best is not None:
        return best
    # No aligned divisor fits.  Never fall back to full C (could exceed the
    # VMEM limit): take the largest (possibly unaligned) divisor that fits.
    # TODO(synk): for very large H*W, split the spatial axis onto the grid
    # instead of shrinking Ct (needs conv-halo handling in the finalize).
    for ct in range(int(max_ct), 0, -1):
        if C % ct == 0:
            return ct
    return 1


def spatial_attention(x, w):
    """x: (N, C, H, W); w: (1, 2, 7, 7) conv weight (OIHW). Returns (N, 1, H, W)."""
    N, C, H, W = x.shape
    hw = H * W

    x_flat = x.reshape(N, C, hw)                              # lane-dense layout
    w_flat = w.reshape(2, KSIZE * KSIZE).astype(jnp.float32)

    budget = _vmem_budget_bytes()
    # Size the C tile so 2 double-buffered input blocks + accumulators + output
    # stay comfortably inside the budget (~1/6 of it per input block).
    ct = _pick_c_tile(C, hw, x.dtype, target_bytes=max(2 << 20, budget // 6))
    grid = (N, C // ct)

    kernel = functools.partial(_spatial_attention_kernel, C=C, H=H, W=W)

    # TODO(synk): when N < number of TensorCores (v7x), add a second parallel
    # grid axis over H*W chunks so both cores get work.
    out_flat = pl.pallas_call(
        kernel,
        out_shape=jax.ShapeDtypeStruct((N, 1, hw), x.dtype),
        grid_spec=pltpu.PrefetchScalarGridSpec(
            num_scalar_prefetch=0,
            grid=grid,
            in_specs=[
                pl.BlockSpec((1, ct, hw), lambda b, c: (b, c, 0)),
                pl.BlockSpec(memory_space=pltpu.MemorySpace.SMEM),
            ],
            out_specs=pl.BlockSpec((1, 1, hw), lambda b, c: (b, 0, 0)),
            scratch_shapes=[
                pltpu.VMEM((1, hw), jnp.float32),   # running channel sum
                pltpu.VMEM((1, hw), jnp.float32),   # running channel max
            ],
        ),
        compiler_params=pltpu.CompilerParams(
            dimension_semantics=("parallel", "arbitrary"),
            vmem_limit_bytes=budget,
        ),
    )(x_flat, w_flat)

    return out_flat.reshape(N, 1, H, W)


def reference_forward(x, w):
    """Pure-JAX reference mirroring the PyTorch module."""
    avg = jnp.mean(x, axis=1, keepdims=True)
    mx = jnp.max(x, axis=1, keepdims=True)
    cat = jnp.concatenate([avg, mx], axis=1)
    y = lax.conv_general_dilated(
        cat.astype(jnp.float32), w.astype(jnp.float32),
        window_strides=(1, 1), padding=((PAD, PAD), (PAD, PAD)),
        dimension_numbers=("NCHW", "OIHW", "NCHW"),
    )
    return jax.nn.sigmoid(y).astype(x.dtype)


if __name__ == "__main__":
    key = jax.random.PRNGKey(0)
    kx, kw = jax.random.split(key)

    N, C, H, W = 2, 4, 16, 16
    x = jax.random.normal(kx, (N, C, H, W), dtype=jnp.float32)
    # nn.Conv2d(2, 1, 7, bias=False)-shaped deterministic weight.
    conv_w = 0.05 * jax.random.normal(kw, (1, 2, KSIZE, KSIZE), dtype=jnp.float32)

    out = jax.block_until_ready(spatial_attention(x, conv_w))
    ref = reference_forward(x, conv_w)

    assert out.shape == (N, 1, H, W), out.shape
    err = jnp.max(jnp.abs(out - ref))
    assert jnp.allclose(out, ref, atol=1e-4, rtol=1e-4), f"max abs err {err}"

    print("KERNEL_OK")
</pallas_src>

<mosaic_0001>
module attributes {stable_mosaic.version = 11 : i64} {
  func.func @_spatial_attention_kernel(%arg0: i32, %arg1: i32, %arg2: memref<1x4x256xf32, #tpu.memory_space<vmem>>, %arg3: memref<2x49xf32, #tpu.memory_space<smem>>, %arg4: memref<1x1x256xf32, #tpu.memory_space<vmem>>, %arg5: memref<1x256xf32, #tpu.memory_space<vmem>>, %arg6: memref<1x256xf32, #tpu.memory_space<vmem>>) attributes {dimension_semantics = [#tpu.dimension_semantics<parallel>, #tpu.dimension_semantics<arbitrary>], iteration_bounds = array<i64: 2, 1>, scalar_prefetch = 0 : i64, scratch_operands = 2 : i64, tpu.core_type = #tpu.core_type<tc>, window_params = [{transform_indices = @transform_0, window_bounds = array<i64: 1, 4, 256>}, {transform_indices = @transform_1, window_bounds = array<i64: 2, 49>}, {transform_indices = @transform_2, window_bounds = array<i64: 1, 1, 256>}]} {
    %c0_i32 = arith.constant 0 : i32
    %0 = arith.cmpi eq, %arg1, %c0_i32 : i32
    %1 = arith.extui %0 : i1 to i32
    %c0_i32_0 = arith.constant 0 : i32
    %2 = arith.cmpi ne, %1, %c0_i32_0 : i32
    scf.if %2 {
      %cst_15 = arith.constant 0.000000e+00 : f32
      %18 = vector.broadcast %cst_15 : f32 to vector<1x256xf32>
      %c0_16 = arith.constant 0 : index
      %c0_17 = arith.constant 0 : index
      %19 = vector.load %arg5[%c0_16, %c0_17] : memref<1x256xf32, #tpu.memory_space<vmem>>, vector<1x256xf32>
      tpu.vector_store %arg5[%c0_16, %c0_17], %18 {strides = array<i32>} : memref<1x256xf32, #tpu.memory_space<vmem>>, vector<1x256xf32>,
      %cst_18 = arith.constant 0xFF800000 : f32
      %20 = vector.broadcast %cst_18 : f32 to vector<1x256xf32>
      %c0_19 = arith.constant 0 : index
      %c0_20 = arith.constant 0 : index
      %21 = vector.load %arg6[%c0_19, %c0_20] : memref<1x256xf32, #tpu.memory_space<vmem>>, vector<1x256xf32>
      tpu.vector_store %arg6[%c0_19, %c0_20], %20 {strides = array<i32>} : memref<1x256xf32, #tpu.memory_space<vmem>>, vector<1x256xf32>,
    } else {
    }
    %c0 = arith.constant 0 : index
    %c0_1 = arith.constant 0 : index
    %c0_2 = arith.constant 0 : index
    %3 = vector.load %arg2[%c0, %c0_1, %c0_2] : memref<1x4x256xf32, #tpu.memory_space<vmem>>, vector<1x4x256xf32>
    %4 = vector.shape_cast %3 : vector<1x4x256xf32> to vector<4x256xf32>
    %cst = arith.constant 1.000000e+00 : f32
    %5 = vector.broadcast %cst : f32 to vector<1x4xf32>
    %c0_3 = arith.constant 0 : index
    %c0_4 = arith.constant 0 : index
    %6 = vector.load %arg5[%c0_3, %c0_4] : memref<1x256xf32, #tpu.memory_space<vmem>>, vector<1x256xf32>
    %cst_5 = arith.constant dense<0.000000e+00> : vector<1x256xf32>
    %7 = tpu.matmul %5, %4, %cst_5 {dimension_numbers = #tpu.dot_dimension_numbers<[1], [0], [0], [1], [0, 0, 1, 1], [], []>} : vector<1x4xf32>, vector<4x256xf32>, vector<1x256xf32> -> vector<1x256xf32>
    %8 = arith.addf %6, %7 : vector<1x256xf32>
    %c0_6 = arith.constant 0 : index
    %c0_7 = arith.constant 0 : index
    %9 = vector.load %arg5[%c0_6, %c0_7] : memref<1x256xf32, #tpu.memory_space<vmem>>, vector<1x256xf32>
    tpu.vector_store %arg5[%c0_6, %c0_7], %8 {strides = array<i32>} : memref<1x256xf32, #tpu.memory_space<vmem>>, vector<1x256xf32>,
    %c0_8 = arith.constant 0 : index
    %c0_9 = arith.constant 0 : index
    %10 = vector.load %arg6[%c0_8, %c0_9] : memref<1x256xf32, #tpu.memory_space<vmem>>, vector<1x256xf32>
    %cst_10 = arith.constant dense<0xFF800000> : vector<256xf32>
    %11 = vector.multi_reduction <maximumf>, %4, %cst_10 [0] : vector<4x256xf32> to vector<256xf32>
    %12 = vector.shape_cast %11 : vector<256xf32> to vector<1x256xf32>
    %13 = arith.maximumf %10, %12 : vector<1x256xf32>
    %c0_11 = arith.constant 0 : index
    %c0_12 = arith.constant 0 : index
    %14 = vector.load %arg6[%c0_11, %c0_12] : memref<1x256xf32, #tpu.memory_space<vmem>>, vector<1x256xf32>
    tpu.vector_store %arg6[%c0_11, %c0_12], %13 {strides = array<i32>} : memref<1x256xf32, #tpu.memory_space<vmem>>, vector<1x256xf32>,
    %c0_i32_13 = arith.constant 0 : i32
    %15 = arith.cmpi eq, %arg1, %c0_i32_13 : i32
    %16 = arith.extui %15 : i1 to i32
    %c0_i32_14 = arith.constant 0 : i32
    %17 = arith.cmpi ne, %16, %c0_i32_14 : i32
    scf.if %17 {
      %c0_15 = arith.constant 0 : index
      %c0_16 = arith.constant 0 : index
      %18 = vector.load %arg5[%c0_15, %c0_16] : memref<1x256xf32, #tpu.memory_space<vmem>>, vector<1x256xf32>
      %cst_17 = arith.constant 2.500000e-01 : f32
      %19 = vector.broadcast %cst_17 : f32 to vector<1x256xf32>
      %20 = arith.mulf %18, %19 : vector<1x256xf32>
      %c0_18 = arith.constant 0 : index
      %c0_19 = arith.constant 0 : index
      %21 = vector.load %arg6[%c0_18, %c0_19] : memref<1x256xf32, #tpu.memory_space<vmem>>, vector<1x256xf32>
      %22 = tpu.concatenate %20, %21 in 0 : vector<1x256xf32>, vector<1x256xf32> -> vector<2x256xf32>
      %23 = tpu.iota {dimensions = array<i32: 1>} : vector<1x256xi32>
      %c15_i32 = arith.constant 15 : i32
      %24 = vector.broadcast %c15_i32 : i32 to vector<1x256xi32>
      %25 = arith.andi %23, %24 : vector<1x256xi32>
      %26 = vector.extract_strided_slice %22 {offsets = [0, 253], sizes = [2, 3], strides = [1, 1]} : vector<2x256xf32> to vector<2x3xf32>
      %27 = vector.extract_strided_slice %22 {offsets = [0, 0], sizes = [2, 253], strides = [1, 1]} : vector<2x256xf32> to vector<2x253xf32>
      %28 = tpu.concatenate %26, %27 in 1 : vector<2x3xf32>, vector<2x253xf32> -> vector<2x256xf32>
      %c3_i32 = arith.constant 3 : i32
      %29 = vector.broadcast %c3_i32 : i32 to vector<1x256xi32>
      %30 = arith.cmpi sge, %25, %29 : vector<1x256xi32>
      %c19_i32 = arith.constant 19 : i32
      %31 = vector.broadcast %c19_i32 : i32 to vector<1x256xi32>
      %32 = arith.cmpi slt, %25, %31 : vector<1x256xi32>
      %33 = arith.andi %30, %32 : vector<1x256xi1>
      %cst_20 = arith.constant 0.000000e+00 : f32
      %34 = vector.shape_cast %33 : vector<1x256xi1> to vector<1x256xi1>
      %35 = vector.broadcast %34 : vector<1x256xi1> to vector<2x256xi1>
      %36 = vector.broadcast %cst_20 : f32 to vector<2x256xf32>
      %37 = arith.select %35, %28, %36 : vector<2x256xi1>, vector<2x256xf32>
      %38 = vector.extract_strided_slice %22 {offsets = [0, 254], sizes = [2, 2], strides = [1, 1]} : vector<2x256xf32> to vector<2x2xf32>
      %39 = vector.extract_strided_slice %22 {offsets = [0, 0], sizes = [2, 254], strides = [1, 1]} : vector<2x256xf32> to vector<2x254xf32>
      %40 = tpu.concatenate %38, %39 in 1 : vector<2x2xf32>, vector<2x254xf32> -> vector<2x256xf32>
      %c2_i32 = arith.constant 2 : i32
      %41 = vector.broadcast %c2_i32 : i32 to vector<1x256xi32>
      %42 = arith.cmpi sge, %25, %41 : vector<1x256xi32>
      %c18_i32 = arith.constant 18 : i32
      %43 = vector.broadcast %c18_i32 : i32 to vector<1x256xi32>
      %44 = arith.cmpi slt, %25, %43 : vector<1x256xi32>
      %45 = arith.andi %42, %44 : vector<1x256xi1>
      %cst_21 = arith.constant 0.000000e+00 : f32
      %46 = vector.shape_cast %45 : vector<1x256xi1> to vector<1x256xi1>
      %47 = vector.broadcast %46 : vector<1x256xi1> to vector<2x256xi1>
      %48 = vector.broadcast %cst_21 : f32 to vector<2x256xf32>
      %49 = arith.select %47, %40, %48 : vector<2x256xi1>, vector<2x256xf32>
      %50 = vector.extract_strided_slice %22 {offsets = [0, 255], sizes = [2, 1], strides = [1, 1]} : vector<2x256xf32> to vector<2x1xf32>
      %51 = vector.extract_strided_slice %22 {offsets = [0, 0], sizes = [2, 255], strides = [1, 1]} : vector<2x256xf32> to vector<2x255xf32>
      %52 = tpu.concatenate %50, %51 in 1 : vector<2x1xf32>, vector<2x255xf32> -> vector<2x256xf32>
      %c1_i32 = arith.constant 1 : i32
      %53 = vector.broadcast %c1_i32 : i32 to vector<1x256xi32>
      %54 = arith.cmpi sge, %25, %53 : vector<1x256xi32>
      %c17_i32 = arith.constant 17 : i32
      %55 = vector.broadcast %c17_i32 : i32 to vector<1x256xi32>
      %56 = arith.cmpi slt, %25, %55 : vector<1x256xi32>
      %57 = arith.andi %54, %56 : vector<1x256xi1>
      %cst_22 = arith.constant 0.000000e+00 : f32
      %58 = vector.shape_cast %57 : vector<1x256xi1> to vector<1x256xi1>
      %59 = vector.broadcast %58 : vector<1x256xi1> to vector<2x256xi1>
      %60 = vector.broadcast %cst_22 : f32 to vector<2x256xf32>
      %61 = arith.select %59, %52, %60 : vector<2x256xi1>, vector<2x256xf32>
      %c0_i32_23 = arith.constant 0 : i32
      %62 = vector.broadcast %c0_i32_23 : i32 to vector<1x256xi32>
      %63 = arith.cmpi sge, %25, %62 : vector<1x256xi32>
      %c16_i32 = arith.constant 16 : i32
      %64 = vector.broadcast %c16_i32 : i32 to vector<1x256xi32>
      %65 = arith.cmpi slt, %25, %64 : vector<1x256xi32>
      %66 = arith.andi %63, %65 : vector<1x256xi1>
      %cst_24 = arith.constant 0.000000e+00 : f32
      %67 = vector.shape_cast %66 : vector<1x256xi1> to vector<1x256xi1>
      %68 = vector.broadcast %67 : vector<1x256xi1> to vector<2x256xi1>
      %69 = vector.broadcast %cst_24 : f32 to vector<2x256xf32>
      %70 = arith.select %68, %22, %69 : vector<2x256xi1>, vector<2x256xf32>
      %71 = vector.extract_strided_slice %22 {offsets = [0, 1], sizes = [2, 255], strides = [1, 1]} : vector<2x256xf32> to vector<2x255xf32>
      %72 = vector.extract_strided_slice %22 {offsets = [0, 0], sizes = [2, 1], strides = [1, 1]} : vector<2x256xf32> to vector<2x1xf32>
      %73 = tpu.concatenate %71, %72 in 1 : vector<2x255xf32>, vector<2x1xf32> -> vector<2x256xf32>
      %c-1_i32 = arith.constant -1 : i32
      %74 = vector.broadcast %c-1_i32 : i32 to vector<1x256xi32>
      %75 = arith.cmpi sge, %25, %74 : vector<1x256xi32>
      %c15_i32_25 = arith.constant 15 : i32
      %76 = vector.broadcast %c15_i32_25 : i32 to vector<1x256xi32>
      %77 = arith.cmpi slt, %25, %76 : vector<1x256xi32>
      %78 = arith.andi %75, %77 : vector<1x256xi1>
      %cst_26 = arith.constant 0.000000e+00 : f32
      %79 = vector.shape_cast %78 : vector<1x256xi1> to vector<1x256xi1>
      %80 = vector.broadcast %79 : vector<1x256xi1> to vector<2x256xi1>
      %81 = vector.broadcast %cst_26 : f32 to vector<2x256xf32>
      %82 = arith.select %80, %73, %81 : vector<2x256xi1>, vector<2x256xf32>
      %83 = vector.extract_strided_slice %22 {offsets = [0, 2], sizes = [2, 254], strides = [1, 1]} : vector<2x256xf32> to vector<2x254xf32>
      %84 = vector.extract_strided_slice %22 {offsets = [0, 0], sizes = [2, 2], strides = [1, 1]} : vector<2x256xf32> to vector<2x2xf32>
      %85 = tpu.concatenate %83, %84 in 1 : vector<2x254xf32>, vector<2x2xf32> -> vector<2x256xf32>
      %c-2_i32 = arith.constant -2 : i32
      %86 = vector.broadcast %c-2_i32 : i32 to vector<1x256xi32>
      %87 = arith.cmpi sge, %25, %86 : vector<1x256xi32>
      %c14_i32 = arith.constant 14 : i32
      %88 = vector.broadcast %c14_i32 : i32 to vector<1x256xi32>
      %89 = arith.cmpi slt, %25, %88 : vector<1x256xi32>
      %90 = arith.andi %87, %89 : vector<1x256xi1>
      %cst_27 = arith.constant 0.000000e+00 : f32
      %91 = vector.shape_cast %90 : vector<1x256xi1> to vector<1x256xi1>
      %92 = vector.broadcast %91 : vector<1x256xi1> to vector<2x256xi1>
      %93 = vector.broadcast %cst_27 : f32 to vector<2x256xf32>
      %94 = arith.select %92, %85, %93 : vector<2x256xi1>, vector<2x256xf32>
      %95 = vector.extract_strided_slice %22 {offsets = [0, 3], sizes = [2, 253], strides = [1, 1]} : vector<2x256xf32> to vector<2x253xf32>
      %96 = vector.extract_strided_slice %22 {offsets = [0, 0], sizes = [2, 3], strides = [1, 1]} : vector<2x256xf32> to vector<2x3xf32>
      %97 = tpu.concatenate %95, %96 in 1 : vector<2x253xf32>, vector<2x3xf32> -> vector<2x256xf32>
      %c-3_i32 = arith.constant -3 : i32
      %98 = vector.broadcast %c-3_i32 : i32 to vector<1x256xi32>
      %99 = arith.cmpi sge, %25, %98 : vector<1x256xi32>
      %c13_i32 = arith.constant 13 : i32
      %100 = vector.broadcast %c13_i32 : i32 to vector<1x256xi32>
      %101 = arith.cmpi slt, %25, %100 : vector<1x256xi32>
      %102 = arith.andi %99, %101 : vector<1x256xi1>
      %cst_28 = arith.constant 0.000000e+00 : f32
      %103 = vector.shape_cast %102 : vector<1x256xi1> to vector<1x256xi1>
      %104 = vector.broadcast %103 : vector<1x256xi1> to vector<2x256xi1>
      %105 = vector.broadcast %cst_28 : f32 to vector<2x256xf32>
      %106 = arith.select %104, %97, %105 : vector<2x256xi1>, vector<2x256xf32>
      %cst_29 = arith.constant 0.000000e+00 : f32
      %107 = vector.broadcast %cst_29 : f32 to vector<1x256xf32>
      %cst_30 = arith.constant 0.000000e+00 : f32
      %108 = vector.broadcast %cst_30 : f32 to vector<1x256xf32>
      %c0_31 = arith.constant 0 : index
      %c0_32 = arith.constant 0 : index
      %109 = memref.load %arg3[%c0_31, %c0_32] : memref<2x49xf32, #tpu.memory_space<smem>>
      %110 = vector.extract_strided_slice %37 {offsets = [0, 0], sizes = [1, 256], strides = [1, 1]} : vector<2x256xf32> to vector<1x256xf32>
      %111 = vector.broadcast %109 : f32 to vector<1x256xf32>
      %112 = arith.mulf %111, %110 : vector<1x256xf32>
      %c1 = arith.constant 1 : index
      %c0_33 = arith.constant 0 : index
      %113 = memref.load %arg3[%c1, %c0_33] : memref<2x49xf32, #tpu.memory_space<smem>>
      %114 = vector.extract_strided_slice %37 {offsets = [1, 0], sizes = [1, 256], strides = [1, 1]} : vector<2x256xf32> to vector<1x256xf32>
      %115 = vector.broadcast %113 : f32 to vector<1x256xf32>
      %116 = arith.mulf %115, %114 : vector<1x256xf32>
      %117 = arith.addf %112, %116 : vector<1x256xf32>
      %118 = arith.addf %108, %117 : vector<1x256xf32>
      %c0_34 = arith.constant 0 : index
      %c1_35 = arith.constant 1 : index
      %119 = memref.load %arg3[%c0_34, %c1_35] : memref<2x49xf32, #tpu.memory_space<smem>>
      %120 = vector.extract_strided_slice %49 {offsets = [0, 0], sizes = [1, 256], strides = [1, 1]} : vector<2x256xf32> to vector<1x256xf32>
      %121 = vector.broadcast %119 : f32 to vector<1x256xf32>
      %122 = arith.mulf %121, %120 : vector<1x256xf32>
      %c1_36 = arith.constant 1 : index
      %c1_37 = arith.constant 1 : index
      %123 = memref.load %arg3[%c1_36, %c1_37] : memref<2x49xf32, #tpu.memory_space<smem>>
      %124 = vector.extract_strided_slice %49 {offsets = [1, 0], sizes = [1, 256], strides = [1, 1]} : vector<2x256xf32> to vector<1x256xf32>
      %125 = vector.broadcast %123 : f32 to vector<1x256xf32>
      %126 = arith.mulf %125, %124 : vector<1x256xf32>
      %127 = arith.addf %122, %126 : vector<1x256xf32>
      %128 = arith.addf %118, %127 : vector<1x256xf32>
      %c0_38 = arith.constant 0 : index
      %c2 = arith.constant 2 : index
      %129 = memref.load %arg3[%c0_38, %c2] : memref<2x49xf32, #tpu.memory_space<smem>>
      %130 = vector.extract_strided_slice %61 {offsets = [0, 0], sizes = [1, 256], strides = [1, 1]} : vector<2x256xf32> to vector<1x256xf32>
      %131 = vector.broadcast %129 : f32 to vector<1x256xf32>
      %132 = arith.mulf %131, %130 : vector<1x256xf32>
      %c1_39 = arith.constant 1 : index
      %c2_40 = arith.constant 2 : index
      %133 = memref.load %arg3[%c1_39, %c2_40] : memref<2x49xf32, #tpu.memory_space<smem>>
      %134 = vector.extract_strided_slice %61 {offsets = [1, 0], sizes = [1, 256], strides = [1, 1]} : vector<2x256xf32> to vector<1x256xf32>
      %135 = vector.broadcast %133 : f32 to vector<1x256xf32>
      %136 = arith.mulf %135, %134 : vector<1x256xf32>
      %137 = arith.addf %132, %136 : vector<1x256xf32>
      %138 = arith.addf %128, %137 : vector<1x256xf32>
      %c0_41 = arith.constant 0 : index
      %c3 = arith.constant 3 : index
      %139 = memref.load %arg3[%c0_41, %c3] : memref<2x49xf32, #tpu.memory_space<smem>>
      %140 = vector.extract_strided_slice %70 {offsets = [0, 0], sizes = [1, 256], strides = [1, 1]} : vector<2x256xf32> to vector<1x256xf32>
      %141 = vector.broadcast %139 : f32 to vector<1x256xf32>
      %142 = arith.mulf %141, %140 : vector<1x256xf32>
      %c1_42 = arith.constant 1 : index
      %c3_43 = arith.constant 3 : index
      %143 = memref.load %arg3[%c1_42, %c3_43] : memref<2x49xf32, #tpu.memory_space<smem>>
      %144 = vector.extract_strided_slice %70 {offsets = [1, 0], sizes = [1, 256], strides = [1, 1]} : vector<2x256xf32> to vector<1x256xf32>
      %145 = vector.broadcast %143 : f32 to vector<1x256xf32>
      %146 = arith.mulf %145, %144 : vector<1x256xf32>
      %147 = arith.addf %142, %146 : vector<1x256xf32>
      %148 = arith.addf %138, %147 : vector<1x256xf32>
      %c0_44 = arith.constant 0 : index
      %c4 = arith.constant 4 : index
      %149 = memref.load %arg3[%c0_44, %c4] : memref<2x49xf32, #tpu.memory_space<smem>>
      %150 = vector.extract_strided_slice %82 {offsets = [0, 0], sizes = [1, 256], strides = [1, 1]} : vector<2x256xf32> to vector<1x256xf32>
      %151 = vector.broadcast %149 : f32 to vector<1x256xf32>
      %152 = arith.mulf %151, %150 : vector<1x256xf32>
      %c1_45 = arith.constant 1 : index
      %c4_46 = arith.constant 4 : index
      %153 = memref.load %arg3[%c1_45, %c4_46] : memref<2x49xf32, #tpu.memory_space<smem>>
      %154 = vector.extract_strided_slice %82 {offsets = [1, 0], sizes = [1, 256], strides = [1, 1]} : vector<2x256xf32> to vector<1x256xf32>
      %155 = vector.broadcast %153 : f32 to vector<1x256xf32>
      %156 = arith.mulf %155, %154 : vector<1x256xf32>
      %157 = arith.addf %152, %156 : vector<1x256xf32>
      %158 = arith.addf %148, %157 : vector<1x256xf32>
      %c0_47 = arith.constant 0 : index
      %c5 = arith.constant 5 : index
      %159 = memref.load %arg3[%c0_47, %c5] : memref<2x49xf32, #tpu.memory_space<smem>>
      %160 = vector.extract_strided_slice %94 {offsets = [0, 0], sizes = [1, 256], strides = [1, 1]} : vector<2x256xf32> to vector<1x256xf32>
      %161 = vector.broadcast %159 : f32 to vector<1x256xf32>
      %162 = arith.mulf %161, %160 : vector<1x256xf32>
      %c1_48 = arith.constant 1 : index
      %c5_49 = arith.constant 5 : index
      %163 = memref.load %arg3[%c1_48, %c5_49] : memref<2x49xf32, #tpu.memory_space<smem>>
      %164 = vector.extract_strided_slice %94 {offsets = [1, 0], sizes = [1, 256], strides = [1, 1]} : vector<2x256xf32> to vector<1x256xf32>
      %165 = vector.broadcast %163 : f32 to vector<1x256xf32>
      %166 = arith.mulf %165, %164 : vector<1x256xf32>
      %167 = arith.addf %162, %166 : vector<1x256xf32>
      %168 = arith.addf %158, %167 : vector<1x256xf32>
      %c0_50 = arith.constant 0 : index
      %c6 = arith.constant 6 : index
      %169 = memref.load %arg3[%c0_50, %c6] : memref<2x49xf32, #tpu.memory_space<smem>>
      %170 = vector.extract_strided_slice %106 {offsets = [0, 0], sizes = [1, 256], strides = [1, 1]} : vector<2x256xf32> to vector<1x256xf32>
      %171 = vector.broadcast %169 : f32 to vector<1x256xf32>
      %172 = arith.mulf %171, %170 : vector<1x256xf32>
      %c1_51 = arith.constant 1 : index
      %c6_52 = arith.constant 6 : index
      %173 = memref.load %arg3[%c1_51, %c6_52] : memref<2x49xf32, #tpu.memory_space<smem>>
      %174 = vector.extract_strided_slice %106 {offsets = [1, 0], sizes = [1, 256], strides = [1, 1]} : vector<2x256xf32> to vector<1x256xf32>
      %175 = vector.broadcast %173 : f32 to vector<1x256xf32>
      %176 = arith.mulf %175, %174 : vector<1x256xf32>
      %177 = arith.addf %172, %176 : vector<1x256xf32>
      %178 = arith.addf %168, %177 : vector<1x256xf32>
      %179 = vector.extract_strided_slice %178 {offsets = [0, 208], sizes = [1, 48], strides = [1, 1]} : vector<1x256xf32> to vector<1x48xf32>
      %180 = vector.extract_strided_slice %178 {offsets = [0, 0], sizes = [1, 208], strides = [1, 1]} : vector<1x256xf32> to vector<1x208xf32>
      %181 = tpu.concatenate %179, %180 in 1 : vector<1x48xf32>, vector<1x208xf32> -> vector<1x256xf32>
      %c48_i32 = arith.constant 48 : i32
      %182 = vector.broadcast %c48_i32 : i32 to vector<1x256xi32>
      %183 = arith.cmpi sge, %23, %182 : vector<1x256xi32>
      %c304_i32 = arith.constant 304 : i32
      %184 = vector.broadcast %c304_i32 : i32 to vector<1x256xi32>
      %185 = arith.cmpi slt, %23, %184 : vector<1x256xi32>
      %186 = arith.andi %183, %185 : vector<1x256xi1>
      %cst_53 = arith.constant 0.000000e+00 : f32
      %187 = vector.broadcast %cst_53 : f32 to vector<1x256xf32>
      %188 = arith.select %186, %181, %187 : vector<1x256xi1>, vector<1x256xf32>
      %189 = arith.addf %107, %188 : vector<1x256xf32>
      %cst_54 = arith.constant 0.000000e+00 : f32
      %190 = vector.broadcast %cst_54 : f32 to vector<1x256xf32>
      %c0_55 = arith.constant 0 : index
      %c7 = arith.constant 7 : index
      %191 = memref.load %arg3[%c0_55, %c7] : memref<2x49xf32, #tpu.memory_space<smem>>
      %192 = vector.extract_strided_slice %37 {offsets = [0, 0], sizes = [1, 256], strides = [1, 1]} : vector<2x256xf32> to vector<1x256xf32>
      %193 = vector.broadcast %191 : f32 to vector<1x256xf32>
      %194 = arith.mulf %193, %192 : vector<1x256xf32>
      %c1_56 = arith.constant 1 : index
      %c7_57 = arith.constant 7 : index
      %195 = memref.load %arg3[%c1_56, %c7_57] : memref<2x49xf32, #tpu.memory_space<smem>>
      %196 = vector.extract_strided_slice %37 {offsets = [1, 0], sizes = [1, 256], strides = [1, 1]} : vector<2x256xf32> to vector<1x256xf32>
      %197 = vector.broadcast %195 : f32 to vector<1x256xf32>
      %198 = arith.mulf %197, %196 : vector<1x256xf32>
      %199 = arith.addf %194, %198 : vector<1x256xf32>
      %200 = arith.addf %190, %199 : vector<1x256xf32>
      %c0_58 = arith.constant 0 : index
      %c8 = arith.constant 8 : index
      %201 = memref.load %arg3[%c0_58, %c8] : memref<2x49xf32, #tpu.memory_space<smem>>
      %202 = vector.extract_strided_slice %49 {offsets = [0, 0], sizes = [1, 256], strides = [1, 1]} : vector<2x256xf32> to vector<1x256xf32>
      %203 = vector.broadcast %201 : f32 to vector<1x256xf32>
      %204 = arith.mulf %203, %202 : vector<1x256xf32>
      %c1_59 = arith.constant 1 : index
      %c8_60 = arith.constant 8 : index
      %205 = memref.load %arg3[%c1_59, %c8_60] : memref<2x49xf32, #tpu.memory_space<smem>>
      %206 = vector.extract_strided_slice %49 {offsets = [1, 0], sizes = [1, 256], strides = [1, 1]} : vector<2x256xf32> to vector<1x256xf32>
      %207 = vector.broadcast %205 : f32 to vector<1x256xf32>
      %208 = arith.mulf %207, %206 : vector<1x256xf32>
      %209 = arith.addf %204, %208 : vector<1x256xf32>
      %210 = arith.addf %200, %209 : vector<1x256xf32>
      %c0_61 = arith.constant 0 : index
      %c9 = arith.constant 9 : index
      %211 = memref.load %arg3[%c0_61, %c9] : memref<2x49xf32, #tpu.memory_space<smem>>
      %212 = vector.extract_strided_slice %61 {offsets = [0, 0], sizes = [1, 256], strides = [1, 1]} : vector<2x256xf32> to vector<1x256xf32>
      %213 = vector.broadcast %211 : f32 to vector<1x256xf32>
      %214 = arith.mulf %213, %212 : vector<1x256xf32>
      %c1_62 = arith.constant 1 : index
      %c9_63 = arith.constant 9 : index
      %215 = memref.load %arg3[%c1_62, %c9_63] : memref<2x49xf32, #tpu.memory_space<smem>>
      %216 = vector.extract_strided_slice %61 {offsets = [1, 0], sizes = [1, 256], strides = [1, 1]} : vector<2x256xf32> to vector<1x256xf32>
      %217 = vector.broadcast %215 : f32 to vector<1x256xf32>
      %218 = arith.mulf %217, %216 : vector<1x256xf32>
      %219 = arith.addf %214, %218 : vector<1x256xf32>
      %220 = arith.addf %210, %219 : vector<1x256xf32>
      %c0_64 = arith.constant 0 : index
      %c10 = arith.constant 10 : index
      %221 = memref.load %arg3[%c0_64, %c10] : memref<2x49xf32, #tpu.memory_space<smem>>
      %222 = vector.extract_strided_slice %70 {offsets = [0, 0], sizes = [1, 256], strides = [1, 1]} : vector<2x256xf32> to vector<1x256xf32>
      %223 = vector.broadcast %221 : f32 to vector<1x256xf32>
      %224 = arith.mulf %223, %222 : vector<1x256xf32>
      %c1_65 = arith.constant 1 : index
      %c10_66 = arith.constant 10 : index
      %225 = memref.load %arg3[%c1_65, %c10_66] : memref<2x49xf32, #tpu.memory_space<smem>>
      %226 = vector.extract_strided_slice %70 {offsets = [1, 0], sizes = [1, 256], strides = [1, 1]} : vector<2x256xf32> to vector<1x256xf32>
      %227 = vector.broadcast %225 : f32 to vector<1x256xf32>
      %228 = arith.mulf %227, %226 : vector<1x256xf32>
      %229 = arith.addf %224, %228 : vector<1x256xf32>
      %230 = arith.addf %220, %229 : vector<1x256xf32>
      %c0_67 = arith.constant 0 : index
      %c11 = arith.constant 11 : index
      %231 = memref.load %arg3[%c0_67, %c11] : memref<2x49xf32, #tpu.memory_space<smem>>
      %232 = vector.extract_strided_slice %82 {offsets = [0, 0], sizes = [1, 256], strides = [1, 1]} : vector<2x256xf32> to vector<1x256xf32>
      %233 = vector.broadcast %231 : f32 to vector<1x256xf32>
      %234 = arith.mulf %233, %232 : vector<1x256xf32>
      %c1_68 = arith.constant 1 : index
      %c11_69 = arith.constant 11 : index
      %235 = memref.load %arg3[%c1_68, %c11_69] : memref<2x49xf32, #tpu.memory_space<smem>>
      %236 = vector.extract_strided_slice %82 {offsets = [1, 0], sizes = [1, 256], strides = [1, 1]} : vector<2x256xf32> to vector<1x256xf32>
      %237 = vector.broadcast %235 : f32 to vector<1x256xf32>
      %238 = arith.mulf %237, %236 : vector<1x256xf32>
      %239 = arith.addf %234, %238 : vector<1x256xf32>
      %240 = arith.addf %230, %239 : vector<1x256xf32>
      %c0_70 = arith.constant 0 : index
      %c12 = arith.constant 12 : index
      %241 = memref.load %arg3[%c0_70, %c12] : memref<2x49xf32, #tpu.memory_space<smem>>
      %242 = vector.extract_strided_slice %94 {offsets = [0, 0], sizes = [1, 256], strides = [1, 1]} : vector<2x256xf32> to vector<1x256xf32>
      %243 = vector.broadcast %241 : f32 to vector<1x256xf32>
      %244 = arith.mulf %243, %242 : vector<1x256xf32>
      %c1_71 = arith.constant 1 : index
      %c12_72 = arith.constant 12 : index
      %245 = memref.load %arg3[%c1_71, %c12_72] : memref<2x49xf32, #tpu.memory_space<smem>>
      %246 = vector.extract_strided_slice %94 {offsets = [1, 0], sizes = [1, 256], strides = [1, 1]} : vector<2x256xf32> to vector<1x256xf32>
      %247 = vector.broadcast %245 : f32 to vector<1x256xf32>
      %248 = arith.mulf %247, %246 : vector<1x256xf32>
      %249 = arith.addf %244, %248 : vector<1x256xf32>
      %250 = arith.addf %240, %249 : vector<1x256xf32>
      %c0_73 = arith.constant 0 : index
      %c13 = arith.constant 13 : index
      %251 = memref.load %arg3[%c0_73, %c13] : memref<2x49xf32, #tpu.memory_space<smem>>
      %252 = vector.extract_strided_slice %106 {offsets = [0, 0], sizes = [1, 256], strides = [1, 1]} : vector<2x256xf32> to vector<1x256xf32>
      %253 = vector.broadcast %251 : f32 to vector<1x256xf32>
      %254 = arith.mulf %253, %252 : vector<1x256xf32>
      %c1_74 = arith.constant 1 : index
      %c13_75 = arith.constant 13 : index
      %255 = memref.load %arg3[%c1_74, %c13_75] : memref<2x49xf32, #tpu.memory_space<smem>>
      %256 = vector.extract_strided_slice %106 {offsets = [1, 0], sizes = [1, 256], strides = [1, 1]} : vector<2x256xf32> to vector<1x256xf32>
      %257 = vector.broadcast %255 : f32 to vector<1x256xf32>
      %258 = arith.mulf %257, %256 : vector<1x256xf32>
      %259 = arith.addf %254, %258 : vector<1x256xf32>
      %260 = arith.addf %250, %259 : vector<1x256xf32>
      %261 = vector.extract_strided_slice %260 {offsets = [0, 224], sizes = [1, 32], strides = [1, 1]} : vector<1x256xf32> to vector<1x32xf32>
      %262 = vector.extract_strided_slice %260 {offsets = [0, 0], sizes = [1, 224], strides = [1, 1]} : vector<1x256xf32> to vector<1x224xf32>
      %263 = tpu.concatenate %261, %262 in 1 : vector<1x32xf32>, vector<1x224xf32> -> vector<1x256xf32>
      %c32_i32 = arith.constant 32 : i32
      %264 = vector.broadcast %c32_i32 : i32 to vector<1x256xi32>
      %265 = arith.cmpi sge, %23, %264 : vector<1x256xi32>
      %c288_i32 = arith.constant 288 : i32
      %266 = vector.broadcast %c288_i32 : i32 to vector<1x256xi32>
      %267 = arith.cmpi slt, %23, %266 : vector<1x256xi32>
      %268 = arith.andi %265, %267 : vector<1x256xi1>
      %cst_76 = arith.constant 0.000000e+00 : f32
      %269 = vector.broadcast %cst_76 : f32 to vector<1x256xf32>
      %270 = arith.select %268, %263, %269 : vector<1x256xi1>, vector<1x256xf32>
      %271 = arith.addf %189, %270 : vector<1x256xf32>
      %cst_77 = arith.constant 0.000000e+00 : f32
      %272 = vector.broadcast %cst_77 : f32 to vector<1x256xf32>
      %c0_78 = arith.constant 0 : index
      %c14 = arith.constant 14 : index
      %273 = memref.load %arg3[%c0_78, %c14] : memref<2x49xf32, #tpu.memory_space<smem>>
      %274 = vector.extract_strided_slice %37 {offsets = [0, 0], sizes = [1, 256], strides = [1, 1]} : vector<2x256xf32> to vector<1x256xf32>
      %275 = vector.broadcast %273 : f32 to vector<1x256xf32>
      %276 = arith.mulf %275, %274 : vector<1x256xf32>
      %c1_79 = arith.constant 1 : index
      %c14_80 = arith.constant 14 : index
      %277 = memref.load %arg3[%c1_79, %c14_80] : memref<2x49xf32, #tpu.memory_space<smem>>
      %278 = vector.extract_strided_slice %37 {offsets = [1, 0], sizes = [1, 256], strides = [1, 1]} : vector<2x256xf32> to vector<1x256xf32>
      %279 = vector.broadcast %277 : f32 to vector<1x256xf32>
      %280 = arith.mulf %279, %278 : vector<1x256xf32>
      %281 = arith.addf %276, %280 : vector<1x256xf32>
      %282 = arith.addf %272, %281 : vector<1x256xf32>
      %c0_81 = arith.constant 0 : index
      %c15 = arith.constant 15 : index
      %283 = memref.load %arg3[%c0_81, %c15] : memref<2x49xf32, #tpu.memory_space<smem>>
      %284 = vector.extract_strided_slice %49 {offsets = [0, 0], sizes = [1, 256], strides = [1, 1]} : vector<2x256xf32> to vector<1x256xf32>
      %285 = vector.broadcast %283 : f32 to vector<1x256xf32>
      %286 = arith.mulf %285, %284 : vector<1x256xf32>
      %c1_82 = arith.constant 1 : index
      %c15_83 = arith.constant 15 : index
      %287 = memref.load %arg3[%c1_82, %c15_83] : memref<2x49xf32, #tpu.memory_space<smem>>
      %288 = vector.extract_strided_slice %49 {offsets = [1, 0], sizes = [1, 256], strides = [1, 1]} : vector<2x256xf32> to vector<1x256xf32>
      %289 = vector.broadcast %287 : f32 to vector<1x256xf32>
      %290 = arith.mulf %289, %288 : vector<1x256xf32>
      %291 = arith.addf %286, %290 : vector<1x256xf32>
      %292 = arith.addf %282, %291 : vector<1x256xf32>
      %c0_84 = arith.constant 0 : index
      %c16 = arith.constant 16 : index
      %293 = memref.load %arg3[%c0_84, %c16] : memref<2x49xf32, #tpu.memory_space<smem>>
      %294 = vector.extract_strided_slice %61 {offsets = [0, 0], sizes = [1, 256], strides = [1, 1]} : vector<2x256xf32> to vector<1x256xf32>
      %295 = vector.broadcast %293 : f32 to vector<1x256xf32>
      %296 = arith.mulf %295, %294 : vector<1x256xf32>
      %c1_85 = arith.constant 1 : index
      %c16_86 = arith.constant 16 : index
      %297 = memref.load %arg3[%c1_85, %c16_86] : memref<2x49xf32, #tpu.memory_space<smem>>
      %298 = vector.extract_strided_slice %61 {offsets = [1, 0], sizes = [1, 256], strides = [1, 1]} : vector<2x256xf32> to vector<1x256xf32>
      %299 = vector.broadcast %297 : f32 to vector<1x256xf32>
      %300 = arith.mulf %299, %298 : vector<1x256xf32>
      %301 = arith.addf %296, %300 : vector<1x256xf32>
      %302 = arith.addf %292, %301 : vector<1x256xf32>
      %c0_87 = arith.constant 0 : index
      %c17 = arith.constant 17 : index
      %303 = memref.load %arg3[%c0_87, %c17] : memref<2x49xf32, #tpu.memory_space<smem>>
      %304 = vector.extract_strided_slice %70 {offsets = [0, 0], sizes = [1, 256], strides = [1, 1]} : vector<2x256xf32> to vector<1x256xf32>
      %305 = vector.broadcast %303 : f32 to vector<1x256xf32>
      %306 = arith.mulf %305, %304 : vector<1x256xf32>
      %c1_88 = arith.constant 1 : index
      %c17_89 = arith.constant 17 : index
      %307 = memref.load %arg3[%c1_88, %c17_89] : memref<2x49xf32, #tpu.memory_space<smem>>
      %308 = vector.extract_strided_slice %70 {offsets = [1, 0], sizes = [1, 256], strides = [1, 1]} : vector<2x256xf32> to vector<1x256xf32>
      %309 = vector.broadcast %307 : f32 to vector<1x256xf32>
      %310 = arith.mulf %309, %308 : vector<1x256xf32>
      %311 = arith.addf %306, %310 : vector<1x256xf32>
      %312 = arith.addf %302, %311 : vector<1x256xf32>
      %c0_90 = arith.constant 0 : index
      %c18 = arith.constant 18 : index
      %313 = memref.load %arg3[%c0_90, %c18] : memref<2x49xf32, #tpu.memory_space<smem>>
      %314 = vector.extract_strided_slice %82 {offsets = [0, 0], sizes = [1, 256], strides = [1, 1]} : vector<2x256xf32> to vector<1x256xf32>
      %315 = vector.broadcast %313 : f32 to vector<1x256xf32>
      %316 = arith.mulf %315, %314 : vector<1x256xf32>
      %c1_91 = arith.constant 1 : index
      %c18_92 = arith.constant 18 : index
      %317 = memref.load %arg3[%c1_91, %c18_92] : memref<2x49xf32, #tpu.memory_space<smem>>
      %318 = vector.extract_strided_slice %82 {offsets = [1, 0], sizes = [1, 256], strides = [1, 1]} : vector<2x256xf32> to vector<1x256xf32>
      %319 = vector.broadcast %317 : f32 to vector<1x256xf32>
      %320 = arith.mulf %319, %318 : vector<1x256xf32>
      %321 = arith.addf %316, %320 : vector<1x256xf32>
      %322 = arith.addf %312, %321 : vector<1x256xf32>
      %c0_93 = arith.constant 0 : index
      %c19 = arith.constant 19 : index
      %323 = memref.load %arg3[%c0_93, %c19] : memref<2x49xf32, #tpu.memory_space<smem>>
      %324 = vector.extract_strided_slice %94 {offsets = [0, 0], sizes = [1, 256], strides = [1, 1]} : vector<2x256xf32> to vector<1x256xf32>
      %325 = vector.broadcast %323 : f32 to vector<1x256xf32>
      %326 = arith.mulf %325, %324 : vector<1x256xf32>
      %c1_94 = arith.constant 1 : index
      %c19_95 = arith.constant 19 : index
      %327 = memref.load %arg3[%c1_94, %c19_95] : memref<2x49xf32, #tpu.memory_space<smem>>
      %328 = vector.extract_strided_slice %94 {offsets = [1, 0], sizes = [1, 256], strides = [1, 1]} : vector<2x256xf32> to vector<1x256xf32>
      %329 = vector.broadcast %327 : f32 to vector<1x256xf32>
      %330 = arith.mulf %329, %328 : vector<1x256xf32>
      %331 = arith.addf %326, %330 : vector<1x256xf32>
      %332 = arith.addf %322, %331 : vector<1x256xf32>
      %c0_96 = arith.constant 0 : index
      %c20 = arith.constant 20 : index
      %333 = memref.load %arg3[%c0_96, %c20] : memref<2x49xf32, #tpu.memory_space<smem>>
      %334 = vector.extract_strided_slice %106 {offsets = [0, 0], sizes = [1, 256], strides = [1, 1]} : vector<2x256xf32> to vector<1x256xf32>
      %335 = vector.broadcast %333 : f32 to vector<1x256xf32>
      %336 = arith.mulf %335, %334 : vector<1x256xf32>
      %c1_97 = arith.constant 1 : index
      %c20_98 = arith.constant 20 : index
      %337 = memref.load %arg3[%c1_97, %c20_98] : memref<2x49xf32, #tpu.memory_space<smem>>
      %338 = vector.extract_strided_slice %106 {offsets = [1, 0], sizes = [1, 256], strides = [1, 1]} : vector<2x256xf32> to vector<1x256xf32>
      %339 = vector.broadcast %337 : f32 to vector<1x256xf32>
      %340 = arith.mulf %339, %338 : vector<1x256xf32>
      %341 = arith.addf %336, %340 : vector<1x256xf32>
      %342 = arith.addf %332, %341 : vector<1x256xf32>
      %343 = vector.extract_strided_slice %342 {offsets = [0, 240], sizes = [1, 16], strides = [1, 1]} : vector<1x256xf32> to vector<1x16xf32>
      %344 = vector.extract_strided_slice %342 {offsets = [0, 0], sizes = [1, 240], strides = [1, 1]} : vector<1x256xf32> to vector<1x240xf32>
      %345 = tpu.concatenate %343, %344 in 1 : vector<1x16xf32>, vector<1x240xf32> -> vector<1x256xf32>
      %c16_i32_99 = arith.constant 16 : i32
      %346 = vector.broadcast %c16_i32_99 : i32 to vector<1x256xi32>
      %347 = arith.cmpi sge, %23, %346 : vector<1x256xi32>
      %c272_i32 = arith.constant 272 : i32
      %348 = vector.broadcast %c272_i32 : i32 to vector<1x256xi32>
      %349 = arith.cmpi slt, %23, %348 : vector<1x256xi32>
      %350 = arith.andi %347, %349 : vector<1x256xi1>
      %cst_100 = arith.constant 0.000000e+00 : f32
      %351 = vector.broadcast %cst_100 : f32 to vector<1x256xf32>
      %352 = arith.select %350, %345, %351 : vector<1x256xi1>, vector<1x256xf32>
      %353 = arith.addf %271, %352 : vector<1x256xf32>
      %cst_101 = arith.constant 0.000000e+00 : f32
      %354 = vector.broadcast %cst_101 : f32 to vector<1x256xf32>
      %c0_102 = arith.constant 0 : index
      %c21 = arith.constant 21 : index
      %355 = memref.load %arg3[%c0_102, %c21] : memref<2x49xf32, #tpu.memory_space<smem>>
      %356 = vector.extract_strided_slice %37 {offsets = [0, 0], sizes = [1, 256], strides = [1, 1]} : vector<2x256xf32> to vector<1x256xf32>
      %357 = vector.broadcast %355 : f32 to vector<1x256xf32>
      %358 = arith.mulf %357, %356 : vector<1x256xf32>
      %c1_103 = arith.constant 1 : index
      %c21_104 = arith.constant 21 : index
      %359 = memref.load %arg3[%c1_103, %c21_104] : memref<2x49xf32, #tpu.memory_space<smem>>
      %360 = vector.extract_strided_slice %37 {offsets = [1, 0], sizes = [1, 256], strides = [1, 1]} : vector<2x256xf32> to vector<1x256xf32>
      %361 = vector.broadcast %359 : f32 to vector<1x256xf32>
      %362 = arith.mulf %361, %360 : vector<1x256xf32>
      %363 = arith.addf %358, %362 : vector<1x256xf32>
      %364 = arith.addf %354, %363 : vector<1x256xf32>
      %c0_105 = arith.constant 0 : index
      %c22 = arith.constant 22 : index
      %365 = memref.load %arg3[%c0_105, %c22] : memref<2x49xf32, #tpu.memory_space<smem>>
      %366 = vector.extract_strided_slice %49 {offsets = [0, 0], sizes = [1, 256], strides = [1, 1]} : vector<2x256xf32> to vector<1x256xf32>
      %367 = vector.broadcast %365 : f32 to vector<1x256xf32>
      %368 = arith.mulf %367, %366 : vector<1x256xf32>
      %c1_106 = arith.constant 1 : index
      %c22_107 = arith.constant 22 : index
      %369 = memref.load %arg3[%c1_106, %c22_107] : memref<2x49xf32, #tpu.memory_space<smem>>
      %370 = vector.extract_strided_slice %49 {offsets = [1, 0], sizes = [1, 256], strides = [1, 1]} : vector<2x256xf32> to vector<1x256xf32>
      %371 = vector.broadcast %369 : f32 to vector<1x256xf32>
      %372 = arith.mulf %371, %370 : vector<1x256xf32>
      %373 = arith.addf %368, %372 : vector<1x256xf32>
      %374 = arith.addf %364, %373 : vector<1x256xf32>
      %c0_108 = arith.constant 0 : index
      %c23 = arith.constant 23 : index
      %375 = memref.load %arg3[%c0_108, %c23] : memref<2x49xf32, #tpu.memory_space<smem>>
      %376 = vector.extract_strided_slice %61 {offsets = [0, 0], sizes = [1, 256], strides = [1, 1]} : vector<2x256xf32> to vector<1x256xf32>
      %377 = vector.broadcast %375 : f32 to vector<1x256xf32>
      %378 = arith.mulf %377, %376 : vector<1x256xf32>
      %c1_109 = arith.constant 1 : index
      %c23_110 = arith.constant 23 : index
      %379 = memref.load %arg3[%c1_109, %c23_110] : memref<2x49xf32, #tpu.memory_space<smem>>
      %380 = vector.extract_strided_slice %61 {offsets = [1, 0], sizes = [1, 256], strides = [1, 1]} : vector<2x256xf32> to vector<1x256xf32>
      %381 = vector.broadcast %379 : f32 to vector<1x256xf32>
      %382 = arith.mulf %381, %380 : vector<1x256xf32>
      %383 = arith.addf %378, %382 : vector<1x256xf32>
      %384 = arith.addf %374, %383 : vector<1x256xf32>
      %c0_111 = arith.constant 0 : index
      %c24 = arith.constant 24 : index
      %385 = memref.load %arg3[%c0_111, %c24] : memref<2x49xf32, #tpu.memory_space<smem>>
      %386 = vector.extract_strided_slice %70 {offsets = [0, 0], sizes = [1, 256], strides = [1, 1]} : vector<2x256xf32> to vector<1x256xf32>
      %387 = vector.broadcast %385 : f32 to vector<1x256xf32>
      %388 = arith.mulf %387, %386 : vector<1x256xf32>
      %c1_112 = arith.constant 1 : index
      %c24_113 = arith.constant 24 : index
      %389 = memref.load %arg3[%c1_112, %c24_113] : memref<2x49xf32, #tpu.memory_space<smem>>
      %390 = vector.extract_strided_slice %70 {offsets = [1, 0], sizes = [1, 256], strides = [1, 1]} : vector<2x256xf32> to vector<1x256xf32>
      %391 = vector.broadcast %389 : f32 to vector<1x256xf32>
      %392 = arith.mulf %391, %390 : vector<1x256xf32>
      %393 = arith.addf %388, %392 : vector<1x256xf32>
      %394 = arith.addf %384, %393 : vector<1x256xf32>
      %c0_114 = arith.constant 0 : index
      %c25 = arith.constant 25 : index
      %395 = memref.load %arg3[%c0_114, %c25] : memref<2x49xf32, #tpu.memory_space<smem>>
      %396 = vector.extract_strided_slice %82 {offsets = [0, 0], sizes = [1, 256], strides = [1, 1]} : vector<2x256xf32> to vector<1x256xf32>
      %397 = vector.broadcast %395 : f32 to vector<1x256xf32>
      %398 = arith.mulf %397, %396 : vector<1x256xf32>
      %c1_115 = arith.constant 1 : index
      %c25_116 = arith.constant 25 : index
      %399 = memref.load %arg3[%c1_115, %c25_116] : memref<2x49xf32, #tpu.memory_space<smem>>
      %400 = vector.extract_strided_slice %82 {offsets = [1, 0], sizes = [1, 256], strides = [1, 1]} : vector<2x256xf32> to vector<1x256xf32>
      %401 = vector.broadcast %399 : f32 to vector<1x256xf32>
      %402 = arith.mulf %401, %400 : vector<1x256xf32>
      %403 = arith.addf %398, %402 : vector<1x256xf32>
      %404 = arith.addf %394, %403 : vector<1x256xf32>
      %c0_117 = arith.constant 0 : index
      %c26 = arith.constant 26 : index
      %405 = memref.load %arg3[%c0_117, %c26] : memref<2x49xf32, #tpu.memory_space<smem>>
      %406 = vector.extract_strided_slice %94 {offsets = [0, 0], sizes = [1, 256], strides = [1, 1]} : vector<2x256xf32> to vector<1x256xf32>
      %407 = vector.broadcast %405 : f32 to vector<1x256xf32>
      %408 = arith.mulf %407, %406 : vector<1x256xf32>
      %c1_118 = arith.constant 1 : index
      %c26_119 = arith.constant 26 : index
      %409 = memref.load %arg3[%c1_118, %c26_119] : memref<2x49xf32, #tpu.memory_space<smem>>
      %410 = vector.extract_strided_slice %94 {offsets = [1, 0], sizes = [1, 256], strides = [1, 1]} : vector<2x256xf32> to vector<1x256xf32>
      %411 = vector.broadcast %409 : f32 to vector<1x256xf32>
      %412 = arith.mulf %411, %410 : vector<1x256xf32>
      %413 = arith.addf %408, %412 : vector<1x256xf32>
      %414 = arith.addf %404, %413 : vector<1x256xf32>
      %c0_120 = arith.constant 0 : index
      %c27 = arith.constant 27 : index
      %415 = memref.load %arg3[%c0_120, %c27] : memref<2x49xf32, #tpu.memory_space<smem>>
      %416 = vector.extract_strided_slice %106 {offsets = [0, 0], sizes = [1, 256], strides = [1, 1]} : vector<2x256xf32> to vector<1x256xf32>
      %417 = vector.broadcast %415 : f32 to vector<1x256xf32>
      %418 = arith.mulf %417, %416 : vector<1x256xf32>
      %c1_121 = arith.constant 1 : index
      %c27_122 = arith.constant 27 : index
      %419 = memref.load %arg3[%c1_121, %c27_122] : memref<2x49xf32, #tpu.memory_space<smem>>
      %420 = vector.extract_strided_slice %106 {offsets = [1, 0], sizes = [1, 256], strides = [1, 1]} : vector<2x256xf32> to vector<1x256xf32>
      %421 = vector.broadcast %419 : f32 to vector<1x256xf32>
      %422 = arith.mulf %421, %420 : vector<1x256xf32>
      %423 = arith.addf %418, %422 : vector<1x256xf32>
      %424 = arith.addf %414, %423 : vector<1x256xf32>
      %c0_i32_123 = arith.constant 0 : i32
      %425 = vector.broadcast %c0_i32_123 : i32 to vector<1x256xi32>
      %426 = arith.cmpi sge, %23, %425 : vector<1x256xi32>
      %c256_i32 = arith.constant 256 : i32
      %427 = vector.broadcast %c256_i32 : i32 to vector<1x256xi32>
      %428 = arith.cmpi slt, %23, %427 : vector<1x256xi32>
      %429 = arith.andi %426, %428 : vector<1x256xi1>
      %cst_124 = arith.constant 0.000000e+00 : f32
      %430 = vector.broadcast %cst_124 : f32 to vector<1x256xf32>
      %431 = arith.select %429, %424, %430 : vector<1x256xi1>, vector<1x256xf32>
      %432 = arith.addf %353, %431 : vector<1x256xf32>
      %cst_125 = arith.constant 0.000000e+00 : f32
      %433 = vector.broadcast %cst_125 : f32 to vector<1x256xf32>
      %c0_126 = arith.constant 0 : index
      %c28 = arith.constant 28 : index
      %434 = memref.load %arg3[%c0_126, %c28] : memref<2x49xf32, #tpu.memory_space<smem>>
      %435 = vector.extract_strided_slice %37 {offsets = [0, 0], sizes = [1, 256], strides = [1, 1]} : vector<2x256xf32> to vector<1x256xf32>
      %436 = vector.broadcast %434 : f32 to vector<1x256xf32>
      %437 = arith.mulf %436, %435 : vector<1x256xf32>
      %c1_127 = arith.constant 1 : index
      %c28_128 = arith.constant 28 : index
      %438 = memref.load %arg3[%c1_127, %c28_128] : memref<2x49xf32, #tpu.memory_space<smem>>
      %439 = vector.extract_strided_slice %37 {offsets = [1, 0], sizes = [1, 256], strides = [1, 1]} : vector<2x256xf32> to vector<1x256xf32>
      %440 = vector.broadcast %438 : f32 to vector<1x256xf32>
      %441 = arith.mulf %440, %439 : vector<1x256xf32>
      %442 = arith.addf %437, %441 : vector<1x256xf32>
      %443 = arith.addf %433, %442 : vector<1x256xf32>
      %c0_129 = arith.constant 0 : index
      %c29 = arith.constant 29 : index
      %444 = memref.load %arg3[%c0_129, %c29] : memref<2x49xf32, #tpu.memory_space<smem>>
      %445 = vector.extract_strided_slice %49 {offsets = [0, 0], sizes = [1, 256], strides = [1, 1]} : vector<2x256xf32> to vector<1x256xf32>
      %446 = vector.broadcast %444 : f32 to vector<1x256xf32>
      %447 = arith.mulf %446, %445 : vector<1x256xf32>
      %c1_130 = arith.constant 1 : index
      %c29_131 = arith.constant 29 : index
      %448 = memref.load %arg3[%c1_130, %c29_131] : memref<2x49xf32, #tpu.memory_space<smem>>
      %449 = vector.extract_strided_slice %49 {offsets = [1, 0], sizes = [1, 256], strides = [1, 1]} : vector<2x256xf32> to vector<1x256xf32>
      %450 = vector.broadcast %448 : f32 to vector<1x256xf32>
      %451 = arith.mulf %450, %449 : vector<1x256xf32>
      %452 = arith.addf %447, %451 : vector<1x256xf32>
      %453 = arith.addf %443, %452 : vector<1x256xf32>
      %c0_132 = arith.constant 0 : index
      %c30 = arith.constant 30 : index
      %454 = memref.load %arg3[%c0_132, %c30] : memref<2x49xf32, #tpu.memory_space<smem>>
      %455 = vector.extract_strided_slice %61 {offsets = [0, 0], sizes = [1, 256], strides = [1, 1]} : vector<2x256xf32> to vector<1x256xf32>
      %456 = vector.broadcast %454 : f32 to vector<1x256xf32>
      %457 = arith.mulf %456, %455 : vector<1x256xf32>
      %c1_133 = arith.constant 1 : index
      %c30_134 = arith.constant 30 : index
      %458 = memref.load %arg3[%c1_133, %c30_134] : memref<2x49xf32, #tpu.memory_space<smem>>
      %459 = vector.extract_strided_slice %61 {offsets = [1, 0], sizes = [1, 256], strides = [1, 1]} : vector<2x256xf32> to vector<1x256xf32>
      %460 = vector.broadcast %458 : f32 to vector<1x256xf32>
      %461 = arith.mulf %460, %459 : vector<1x256xf32>
      %462 = arith.addf %457, %461 : vector<1x256xf32>
      %463 = arith.addf %453, %462 : vector<1x256xf32>
      %c0_135 = arith.constant 0 : index
      %c31 = arith.constant 31 : index
      %464 = memref.load %arg3[%c0_135, %c31] : memref<2x49xf32, #tpu.memory_space<smem>>
      %465 = vector.extract_strided_slice %70 {offsets = [0, 0], sizes = [1, 256], strides = [1, 1]} : vector<2x256xf32> to vector<1x256xf32>
      %466 = vector.broadcast %464 : f32 to vector<1x256xf32>
      %467 = arith.mulf %466, %465 : vector<1x256xf32>
      %c1_136 = arith.constant 1 : index
      %c31_137 = arith.constant 31 : index
      %468 = memref.load %arg3[%c1_136, %c31_137] : memref<2x49xf32, #tpu.memory_space<smem>>
      %469 = vector.extract_strided_slice %70 {offsets = [1, 0], sizes = [1, 256], strides = [1, 1]} : vector<2x256xf32> to vector<1x256xf32>
      %470 = vector.broadcast %468 : f32 to vector<1x256xf32>
      %471 = arith.mulf %470, %469 : vector<1x256xf32>
      %472 = arith.addf %467, %471 : vector<1x256xf32>
      %473 = arith.addf %463, %472 : vector<1x256xf32>
      %c0_138 = arith.constant 0 : index
      %c32 = arith.constant 32 : index
      %474 = memref.load %arg3[%c0_138, %c32] : memref<2x49xf32, #tpu.memory_space<smem>>
      %475 = vector.extract_strided_slice %82 {offsets = [0, 0], sizes = [1, 256], strides = [1, 1]} : vector<2x256xf32> to vector<1x256xf32>
      %476 = vector.broadcast %474 : f32 to vector<1x256xf32>
      %477 = arith.mulf %476, %475 : vector<1x256xf32>
      %c1_139 = arith.constant 1 : index
      %c32_140 = arith.constant 32 : index
      %478 = memref.load %arg3[%c1_139, %c32_140] : memref<2x49xf32, #tpu.memory_space<smem>>
      %479 = vector.extract_strided_slice %82 {offsets = [1, 0], sizes = [1, 256], strides = [1, 1]} : vector<2x256xf32> to vector<1x256xf32>
      %480 = vector.broadcast %478 : f32 to vector<1x256xf32>
      %481 = arith.mulf %480, %479 : vector<1x256xf32>
      %482 = arith.addf %477, %481 : vector<1x256xf32>
      %483 = arith.addf %473, %482 : vector<1x256xf32>
      %c0_141 = arith.constant 0 : index
      %c33 = arith.constant 33 : index
      %484 = memref.load %arg3[%c0_141, %c33] : memref<2x49xf32, #tpu.memory_space<smem>>
      %485 = vector.extract_strided_slice %94 {offsets = [0, 0], sizes = [1, 256], strides = [1, 1]} : vector<2x256xf32> to vector<1x256xf32>
      %486 = vector.broadcast %484 : f32 to vector<1x256xf32>
      %487 = arith.mulf %486, %485 : vector<1x256xf32>
      %c1_142 = arith.constant 1 : index
      %c33_143 = arith.constant 33 : index
      %488 = memref.load %arg3[%c1_142, %c33_143] : memref<2x49xf32, #tpu.memory_space<smem>>
      %489 = vector.extract_strided_slice %94 {offsets = [1, 0], sizes = [1, 256], strides = [1, 1]} : vector<2x256xf32> to vector<1x256xf32>
      %490 = vector.broadcast %488 : f32 to vector<1x256xf32>
      %491 = arith.mulf %490, %489 : vector<1x256xf32>
      %492 = arith.addf %487, %491 : vector<1x256xf32>
      %493 = arith.addf %483, %492 : vector<1x256xf32>
      %c0_144 = arith.constant 0 : index
      %c34 = arith.constant 34 : index
      %494 = memref.load %arg3[%c0_144, %c34] : memref<2x49xf32, #tpu.memory_space<smem>>
      %495 = vector.extract_strided_slice %106 {offsets = [0, 0], sizes = [1, 256], strides = [1, 1]} : vector<2x256xf32> to vector<1x256xf32>
      %496 = vector.broadcast %494 : f32 to vector<1x256xf32>
      %497 = arith.mulf %496, %495 : vector<1x256xf32>
      %c1_145 = arith.constant 1 : index
      %c34_146 = arith.constant 34 : index
      %498 = memref.load %arg3[%c1_145, %c34_146] : memref<2x49xf32, #tpu.memory_space<smem>>
      %499 = vector.extract_strided_slice %106 {offsets = [1, 0], sizes = [1, 256], strides = [1, 1]} : vector<2x256xf32> to vector<1x256xf32>
      %500 = vector.broadcast %498 : f32 to vector<1x256xf32>
      %501 = arith.mulf %500, %499 : vector<1x256xf32>
      %502 = arith.addf %497, %501 : vector<1x256xf32>
      %503 = arith.addf %493, %502 : vector<1x256xf32>
      %504 = vector.extract_strided_slice %503 {offsets = [0, 16], sizes = [1, 240], strides = [1, 1]} : vector<1x256xf32> to vector<1x240xf32>
      %505 = vector.extract_strided_slice %503 {offsets = [0, 0], sizes = [1, 16], strides = [1, 1]} : vector<1x256xf32> to vector<1x16xf32>
      %506 = tpu.concatenate %504, %505 in 1 : vector<1x240xf32>, vector<1x16xf32> -> vector<1x256xf32>
      %c-16_i32 = arith.constant -16 : i32
      %507 = vector.broadcast %c-16_i32 : i32 to vector<1x256xi32>
      %508 = arith.cmpi sge, %23, %507 : vector<1x256xi32>
      %c240_i32 = arith.constant 240 : i32
      %509 = vector.broadcast %c240_i32 : i32 to vector<1x256xi32>
      %510 = arith.cmpi slt, %23, %509 : vector<1x256xi32>
      %511 = arith.andi %508, %510 : vector<1x256xi1>
      %cst_147 = arith.constant 0.000000e+00 : f32
      %512 = vector.broadcast %cst_147 : f32 to vector<1x256xf32>
      %513 = arith.select %511, %506, %512 : vector<1x256xi1>, vector<1x256xf32>
      %514 = arith.addf %432, %513 : vector<1x256xf32>
      %cst_148 = arith.constant 0.000000e+00 : f32
      %515 = vector.broadcast %cst_148 : f32 to vector<1x256xf32>
      %c0_149 = arith.constant 0 : index
      %c35 = arith.constant 35 : index
      %516 = memref.load %arg3[%c0_149, %c35] : memref<2x49xf32, #tpu.memory_space<smem>>
      %517 = vector.extract_strided_slice %37 {offsets = [0, 0], sizes = [1, 256], strides = [1, 1]} : vector<2x256xf32> to vector<1x256xf32>
      %518 = vector.broadcast %516 : f32 to vector<1x256xf32>
      %519 = arith.mulf %518, %517 : vector<1x256xf32>
      %c1_150 = arith.constant 1 : index
      %c35_151 = arith.constant 35 : index
      %520 = memref.load %arg3[%c1_150, %c35_151] : memref<2x49xf32, #tpu.memory_space<smem>>
      %521 = vector.extract_strided_slice %37 {offsets = [1, 0], sizes = [1, 256], strides = [1, 1]} : vector<2x256xf32> to vector<1x256xf32>
      %522 = vector.broadcast %520 : f32 to vector<1x256xf32>
      %523 = arith.mulf %522, %521 : vector<1x256xf32>
      %524 = arith.addf %519, %523 : vector<1x256xf32>
      %525 = arith.addf %515, %524 : vector<1x256xf32>
      %c0_152 = arith.constant 0 : index
      %c36 = arith.constant 36 : index
      %526 = memref.load %arg3[%c0_152, %c36] : memref<2x49xf32, #tpu.memory_space<smem>>
      %527 = vector.extract_strided_slice %49 {offsets = [0, 0], sizes = [1, 256], strides = [1, 1]} : vector<2x256xf32> to vector<1x256xf32>
      %528 = vector.broadcast %526 : f32 to vector<1x256xf32>
      %529 = arith.mulf %528, %527 : vector<1x256xf32>
      %c1_153 = arith.constant 1 : index
      %c36_154 = arith.constant 36 : index
      %530 = memref.load %arg3[%c1_153, %c36_154] : memref<2x49xf32, #tpu.memory_space<smem>>
      %531 = vector.extract_strided_slice %49 {offsets = [1, 0], sizes = [1, 256], strides = [1, 1]} : vector<2x256xf32> to vector<1x256xf32>
      %532 = vector.broadcast %530 : f32 to vector<1x256xf32>
      %533 = arith.mulf %532, %531 : vector<1x256xf32>
      %534 = arith.addf %529, %533 : vector<1x256xf32>
      %535 = arith.addf %525, %534 : vector<1x256xf32>
      %c0_155 = arith.constant 0 : index
      %c37 = arith.constant 37 : index
      %536 = memref.load %arg3[%c0_155, %c37] : memref<2x49xf32, #tpu.memory_space<smem>>
      %537 = vector.extract_strided_slice %61 {offsets = [0, 0], sizes = [1, 256], strides = [1, 1]} : vector<2x256xf32> to vector<1x256xf32>
      %538 = vector.broadcast %536 : f32 to vector<1x256xf32>
      %539 = arith.mulf %538, %537 : vector<1x256xf32>
      %c1_156 = arith.constant 1 : index
      %c37_157 = arith.constant 37 : index
      %540 = memref.load %arg3[%c1_156, %c37_157] : memref<2x49xf32, #tpu.memory_space<smem>>
      %541 = vector.extract_strided_slice %61 {offsets = [1, 0], sizes = [1, 256], strides = [1, 1]} : vector<2x256xf32> to vector<1x256xf32>
      %542 = vector.broadcast %540 : f32 to vector<1x256xf32>
      %543 = arith.mulf %542, %541 : vector<1x256xf32>
      %544 = arith.addf %539, %543 : vector<1x256xf32>
      %545 = arith.addf %535, %544 : vector<1x256xf32>
      %c0_158 = arith.constant 0 : index
      %c38 = arith.constant 38 : index
      %546 = memref.load %arg3[%c0_158, %c38] : memref<2x49xf32, #tpu.memory_space<smem>>
      %547 = vector.extract_strided_slice %70 {offsets = [0, 0], sizes = [1, 256], strides = [1, 1]} : vector<2x256xf32> to vector<1x256xf32>
      %548 = vector.broadcast %546 : f32 to vector<1x256xf32>
      %549 = arith.mulf %548, %547 : vector<1x256xf32>
      %c1_159 = arith.constant 1 : index
      %c38_160 = arith.constant 38 : index
      %550 = memref.load %arg3[%c1_159, %c38_160] : memref<2x49xf32, #tpu.memory_space<smem>>
      %551 = vector.extract_strided_slice %70 {offsets = [1, 0], sizes = [1, 256], strides = [1, 1]} : vector<2x256xf32> to vector<1x256xf32>
      %552 = vector.broadcast %550 : f32 to vector<1x256xf32>
      %553 = arith.mulf %552, %551 : vector<1x256xf32>
      %554 = arith.addf %549, %553 : vector<1x256xf32>
      %555 = arith.addf %545, %554 : vector<1x256xf32>
      %c0_161 = arith.constant 0 : index
      %c39 = arith.constant 39 : index
      %556 = memref.load %arg3[%c0_161, %c39] : memref<2x49xf32, #tpu.memory_space<smem>>
      %557 = vector.extract_strided_slice %82 {offsets = [0, 0], sizes = [1, 256], strides = [1, 1]} : vector<2x256xf32> to vector<1x256xf32>
      %558 = vector.broadcast %556 : f32 to vector<1x256xf32>
      %559 = arith.mulf %558, %557 : vector<1x256xf32>
      %c1_162 = arith.constant 1 : index
      %c39_163 = arith.constant 39 : index
      %560 = memref.load %arg3[%c1_162, %c39_163] : memref<2x49xf32, #tpu.memory_space<smem>>
      %561 = vector.extract_strided_slice %82 {offsets = [1, 0], sizes = [1, 256], strides = [1, 1]} : vector<2x256xf32> to vector<1x256xf32>
      %562 = vector.broadcast %560 : f32 to vector<1x256xf32>
      %563 = arith.mulf %562, %561 : vector<1x256xf32>
      %564 = arith.addf %559, %563 : vector<1x256xf32>
      %565 = arith.addf %555, %564 : vector<1x256xf32>
      %c0_164 = arith.constant 0 : index
      %c40 = arith.constant 40 : index
      %566 = memref.load %arg3[%c0_164, %c40] : memref<2x49xf32, #tpu.memory_space<smem>>
      %567 = vector.extract_strided_slice %94 {offsets = [0, 0], sizes = [1, 256], strides = [1, 1]} : vector<2x256xf32> to vector<1x256xf32>
      %568 = vector.broadcast %566 : f32 to vector<1x256xf32>
      %569 = arith.mulf %568, %567 : vector<1x256xf32>
      %c1_165 = arith.constant 1 : index
      %c40_166 = arith.constant 40 : index
      %570 = memref.load %arg3[%c1_165, %c40_166] : memref<2x49xf32, #tpu.memory_space<smem>>
      %571 = vector.extract_strided_slice %94 {offsets = [1, 0], sizes = [1, 256], strides = [1, 1]} : vector<2x256xf32> to vector<1x256xf32>
      %572 = vector.broadcast %570 : f32 to vector<1x256xf32>
      %573 = arith.mulf %572, %571 : vector<1x256xf32>
      %574 = arith.addf %569, %573 : vector<1x256xf32>
      %575 = arith.addf %565, %574 : vector<1x256xf32>
      %c0_167 = arith.constant 0 : index
      %c41 = arith.constant 41 : index
      %576 = memref.load %arg3[%c0_167, %c41] : memref<2x49xf32, #tpu.memory_space<smem>>
      %577 = vector.extract_strided_slice %106 {offsets = [0, 0], sizes = [1, 256], strides = [1, 1]} : vector<2x256xf32> to vector<1x256xf32>
      %578 = vector.broadcast %576 : f32 to vector<1x256xf32>
      %579 = arith.mulf %578, %577 : vector<1x256xf32>
      %c1_168 = arith.constant 1 : index
      %c41_169 = arith.constant 41 : index
      %580 = memref.load %arg3[%c1_168, %c41_169] : memref<2x49xf32, #tpu.memory_space<smem>>
      %581 = vector.extract_strided_slice %106 {offsets = [1, 0], sizes = [1, 256], strides = [1, 1]} : vector<2x256xf32> to vector<1x256xf32>
      %582 = vector.broadcast %580 : f32 to vector<1x256xf32>
      %583 = arith.mulf %582, %581 : vector<1x256xf32>
      %584 = arith.addf %579, %583 : vector<1x256xf32>
      %585 = arith.addf %575, %584 : vector<1x256xf32>
      %586 = vector.extract_strided_slice %585 {offsets = [0, 32], sizes = [1, 224], strides = [1, 1]} : vector<1x256xf32> to vector<1x224xf32>
      %587 = vector.extract_strided_slice %585 {offsets = [0, 0], sizes = [1, 32], strides = [1, 1]} : vector<1x256xf32> to vector<1x32xf32>
      %588 = tpu.concatenate %586, %587 in 1 : vector<1x224xf32>, vector<1x32xf32> -> vector<1x256xf32>
      %c-32_i32 = arith.constant -32 : i32
      %589 = vector.broadcast %c-32_i32 : i32 to vector<1x256xi32>
      %590 = arith.cmpi sge, %23, %589 : vector<1x256xi32>
      %c224_i32 = arith.constant 224 : i32
      %591 = vector.broadcast %c224_i32 : i32 to vector<1x256xi32>
      %592 = arith.cmpi slt, %23, %591 : vector<1x256xi32>
      %593 = arith.andi %590, %592 : vector<1x256xi1>
      %cst_170 = arith.constant 0.000000e+00 : f32
      %594 = vector.broadcast %cst_170 : f32 to vector<1x256xf32>
      %595 = arith.select %593, %588, %594 : vector<1x256xi1>, vector<1x256xf32>
      %596 = arith.addf %514, %595 : vector<1x256xf32>
      %cst_171 = arith.constant 0.000000e+00 : f32
      %597 = vector.broadcast %cst_171 : f32 to vector<1x256xf32>
      %c0_172 = arith.constant 0 : index
      %c42 = arith.constant 42 : index
      %598 = memref.load %arg3[%c0_172, %c42] : memref<2x49xf32, #tpu.memory_space<smem>>
      %599 = vector.extract_strided_slice %37 {offsets = [0, 0], sizes = [1, 256], strides = [1, 1]} : vector<2x256xf32> to vector<1x256xf32>
      %600 = vector.broadcast %598 : f32 to vector<1x256xf32>
      %601 = arith.mulf %600, %599 : vector<1x256xf32>
      %c1_173 = arith.constant 1 : index
      %c42_174 = arith.constant 42 : index
      %602 = memref.load %arg3[%c1_173, %c42_174] : memref<2x49xf32, #tpu.memory_space<smem>>
      %603 = vector.extract_strided_slice %37 {offsets = [1, 0], sizes = [1, 256], strides = [1, 1]} : vector<2x256xf32> to vector<1x256xf32>
      %604 = vector.broadcast %602 : f32 to vector<1x256xf32>
      %605 = arith.mulf %604, %603 : vector<1x256xf32>
      %606 = arith.addf %601, %605 : vector<1x256xf32>
      %607 = arith.addf %597, %606 : vector<1x256xf32>
      %c0_175 = arith.constant 0 : index
      %c43 = arith.constant 43 : index
      %608 = memref.load %arg3[%c0_175, %c43] : memref<2x49xf32, #tpu.memory_space<smem>>
      %609 = vector.extract_strided_slice %49 {offsets = [0, 0], sizes = [1, 256], strides = [1, 1]} : vector<2x256xf32> to vector<1x256xf32>
      %610 = vector.broadcast %608 : f32 to vector<1x256xf32>
      %611 = arith.mulf %610, %609 : vector<1x256xf32>
      %c1_176 = arith.constant 1 : index
      %c43_177 = arith.constant 43 : index
      %612 = memref.load %arg3[%c1_176, %c43_177] : memref<2x49xf32, #tpu.memory_space<smem>>
      %613 = vector.extract_strided_slice %49 {offsets = [1, 0], sizes = [1, 256], strides = [1, 1]} : vector<2x256xf32> to vector<1x256xf32>
      %614 = vector.broadcast %612 : f32 to vector<1x256xf32>
      %615 = arith.mulf %614, %613 : vector<1x256xf32>
      %616 = arith.addf %611, %615 : vector<1x256xf32>
      %617 = arith.addf %607, %616 : vector<1x256xf32>
      %c0_178 = arith.constant 0 : index
      %c44 = arith.constant 44 : index
      %618 = memref.load %arg3[%c0_178, %c44] : memref<2x49xf32, #tpu.memory_space<smem>>
      %619 = vector.extract_strided_slice %61 {offsets = [0, 0], sizes = [1, 256], strides = [1, 1]} : vector<2x256xf32> to vector<1x256xf32>
      %620 = vector.broadcast %618 : f32 to vector<1x256xf32>
      %621 = arith.mulf %620, %619 : vector<1x256xf32>
      %c1_179 = arith.constant 1 : index
      %c44_180 = arith.constant 44 : index
      %622 = memref.load %arg3[%c1_179, %c44_180] : memref<2x49xf32, #tpu.memory_space<smem>>
      %623 = vector.extract_strided_slice %61 {offsets = [1, 0], sizes = [1, 256], strides = [1, 1]} : vector<2x256xf32> to vector<1x256xf32>
      %624 = vector.broadcast %622 : f32 to vector<1x256xf32>
      %625 = arith.mulf %624, %623 : vector<1x256xf32>
      %626 = arith.addf %621, %625 : vector<1x256xf32>
      %627 = arith.addf %617, %626 : vector<1x256xf32>
      %c0_181 = arith.constant 0 : index
      %c45 = arith.constant 45 : index
      %628 = memref.load %arg3[%c0_181, %c45] : memref<2x49xf32, #tpu.memory_space<smem>>
      %629 = vector.extract_strided_slice %70 {offsets = [0, 0], sizes = [1, 256], strides = [1, 1]} : vector<2x256xf32> to vector<1x256xf32>
      %630 = vector.broadcast %628 : f32 to vector<1x256xf32>
      %631 = arith.mulf %630, %629 : vector<1x256xf32>
      %c1_182 = arith.constant 1 : index
      %c45_183 = arith.constant 45 : index
      %632 = memref.load %arg3[%c1_182, %c45_183] : memref<2x49xf32, #tpu.memory_space<smem>>
      %633 = vector.extract_strided_slice %70 {offsets = [1, 0], sizes = [1, 256], strides = [1, 1]} : vector<2x256xf32> to vector<1x256xf32>
      %634 = vector.broadcast %632 : f32 to vector<1x256xf32>
      %635 = arith.mulf %634, %633 : vector<1x256xf32>
      %636 = arith.addf %631, %635 : vector<1x256xf32>
      %637 = arith.addf %627, %636 : vector<1x256xf32>
      %c0_184 = arith.constant 0 : index
      %c46 = arith.constant 46 : index
      %638 = memref.load %arg3[%c0_184, %c46] : memref<2x49xf32, #tpu.memory_space<smem>>
      %639 = vector.extract_strided_slice %82 {offsets = [0, 0], sizes = [1, 256], strides = [1, 1]} : vector<2x256xf32> to vector<1x256xf32>
      %640 = vector.broadcast %638 : f32 to vector<1x256xf32>
      %641 = arith.mulf %640, %639 : vector<1x256xf32>
      %c1_185 = arith.constant 1 : index
      %c46_186 = arith.constant 46 : index
      %642 = memref.load %arg3[%c1_185, %c46_186] : memref<2x49xf32, #tpu.memory_space<smem>>
      %643 = vector.extract_strided_slice %82 {offsets = [1, 0], sizes = [1, 256], strides = [1, 1]} : vector<2x256xf32> to vector<1x256xf32>
      %644 = vector.broadcast %642 : f32 to vector<1x256xf32>
      %645 = arith.mulf %644, %643 : vector<1x256xf32>
      %646 = arith.addf %641, %645 : vector<1x256xf32>
      %647 = arith.addf %637, %646 : vector<1x256xf32>
      %c0_187 = arith.constant 0 : index
      %c47 = arith.constant 47 : index
      %648 = memref.load %arg3[%c0_187, %c47] : memref<2x49xf32, #tpu.memory_space<smem>>
      %649 = vector.extract_strided_slice %94 {offsets = [0, 0], sizes = [1, 256], strides = [1, 1]} : vector<2x256xf32> to vector<1x256xf32>
      %650 = vector.broadcast %648 : f32 to vector<1x256xf32>
      %651 = arith.mulf %650, %649 : vector<1x256xf32>
      %c1_188 = arith.constant 1 : index
      %c47_189 = arith.constant 47 : index
      %652 = memref.load %arg3[%c1_188, %c47_189] : memref<2x49xf32, #tpu.memory_space<smem>>
      %653 = vector.extract_strided_slice %94 {offsets = [1, 0], sizes = [1, 256], strides = [1, 1]} : vector<2x256xf32> to vector<1x256xf32>
      %654 = vector.broadcast %652 : f32 to vector<1x256xf32>
      %655 = arith.mulf %654, %653 : vector<1x256xf32>
      %656 = arith.addf %651, %655 : vector<1x256xf32>
      %657 = arith.addf %647, %656 : vector<1x256xf32>
      %c0_190 = arith.constant 0 : index
      %c48 = arith.constant 48 : index
      %658 = memref.load %arg3[%c0_190, %c48] : memref<2x49xf32, #tpu.memory_space<smem>>
      %659 = vector.extract_strided_slice %106 {offsets = [0, 0], sizes = [1, 256], strides = [1, 1]} : vector<2x256xf32> to vector<1x256xf32>
      %660 = vector.broadcast %658 : f32 to vector<1x256xf32>
      %661 = arith.mulf %660, %659 : vector<1x256xf32>
      %c1_191 = arith.constant 1 : index
      %c48_192 = arith.constant 48 : index
      %662 = memref.load %arg3[%c1_191, %c48_192] : memref<2x49xf32, #tpu.memory_space<smem>>
      %663 = vector.extract_strided_slice %106 {offsets = [1, 0], sizes = [1, 256], strides = [1, 1]} : vector<2x256xf32> to vector<1x256xf32>
      %664 = vector.broadcast %662 : f32 to vector<1x256xf32>
      %665 = arith.mulf %664, %663 : vector<1x256xf32>
      %666 = arith.addf %661, %665 : vector<1x256xf32>
      %667 = arith.addf %657, %666 : vector<1x256xf32>
      %668 = vector.extract_strided_slice %667 {offsets = [0, 48], sizes = [1, 208], strides = [1, 1]} : vector<1x256xf32> to vector<1x208xf32>
      %669 = vector.extract_strided_slice %667 {offsets = [0, 0], sizes = [1, 48], strides = [1, 1]} : vector<1x256xf32> to vector<1x48xf32>
      %670 = tpu.concatenate %668, %669 in 1 : vector<1x208xf32>, vector<1x48xf32> -> vector<1x256xf32>
      %c-48_i32 = arith.constant -48 : i32
      %671 = vector.broadcast %c-48_i32 : i32 to vector<1x256xi32>
      %672 = arith.cmpi sge, %23, %671 : vector<1x256xi32>
      %c208_i32 = arith.constant 208 : i32
      %673 = vector.broadcast %c208_i32 : i32 to vector<1x256xi32>
      %674 = arith.cmpi slt, %23, %673 : vector<1x256xi32>
      %675 = arith.andi %672, %674 : vector<1x256xi1>
      %cst_193 = arith.constant 0.000000e+00 : f32
      %676 = vector.broadcast %cst_193 : f32 to vector<1x256xf32>
      %677 = arith.select %675, %670, %676 : vector<1x256xi1>, vector<1x256xf32>
      %678 = arith.addf %596, %677 : vector<1x256xf32>
      %679 = arith.negf %678 : vector<1x256xf32>
      %680 = math.exp %679 : vector<1x256xf32>
      %cst_194 = arith.constant 1.000000e+00 : f32
      %681 = vector.broadcast %cst_194 : f32 to vector<1x256xf32>
      %682 = arith.addf %681, %680 : vector<1x256xf32>
      %683 = arith.divf %681, %682 : vector<1x256xf32>
      %684 = vector.shape_cast %683 : vector<1x256xf32> to vector<1x1x256xf32>
      %c0_195 = arith.constant 0 : index
      %c0_196 = arith.constant 0 : index
      %c0_197 = arith.constant 0 : index
      %685 = vector.load %arg4[%c0_195, %c0_196, %c0_197] : memref<1x1x256xf32, #tpu.memory_space<vmem>>, vector<1x1x256xf32>
      tpu.vector_store %arg4[%c0_195, %c0_196, %c0_197], %684 {strides = array<i32>} : memref<1x1x256xf32, #tpu.memory_space<vmem>>, vector<1x1x256xf32>,
    } else {
    }
    return
  }
  func.func @transform_0(%arg0: i32, %arg1: i32) -> (i32, i32, i32) {
    %c0_i32 = arith.constant 0 : i32
    %c0_i32_0 = arith.constant 0 : i32
    return %arg0, %arg1, %c0_i32 : i32, i32, i32
  }
  func.func @transform_1(%arg0: i32, %arg1: i32) -> (i32, i32) {
    %c0_i32 = arith.constant 0 : i32
    %c0_i32_0 = arith.constant 0 : i32
    %c0_i32_1 = arith.constant 0 : i32
    return %c0_i32, %c0_i32_0 : i32, i32
  }
  func.func @transform_2(%arg0: i32, %arg1: i32) -> (i32, i32, i32) {
    %c0_i32 = arith.constant 0 : i32
    %c0_i32_0 = arith.constant 0 : i32
    %c0_i32_1 = arith.constant 0 : i32
    return %arg0, %c0_i32, %c0_i32_0 : i32, i32, i32
  }
}

</mosaic_0001>

<bundles_post_ra>
// kernel: tpu_custom_call.1
= control target key start
LH: loop header
LB: loop body
LE: loop exit
PB: predicated region body
PF: predicated region fallthrough
CT: control target
= control target key end

     0   :  { %s3259_s0 = inlined_call_operand.hbm [shape: f32[2,4,256], index: 0, kind: input, shape index: {}]   ;;  %s3260_s1 = inlined_call_operand.vmem [shape: f32[2,49], index: 1, kind: input, shape index: {}]   ;;  %s3261_s2 = inlined_call_operand.hbm [shape: f32[2,1,256], index: 2, kind: output, shape index: {}]  }
   0x1   :  { %3382 = sst [smem:[#allocation81_spill]] %s3259_s0 }
   0x2   :  { %3383 = sst [smem:[#allocation82_spill]] %s3260_s1 }
   0x3   :  { %3384 = sst [smem:[#allocation83_spill]] %s3261_s2 }
   0x4   :  { %7 = vsyncpa [#allocation5], 0 }
   0x5   :  { %9 = vsyncpa [#allocation5 + $0x1], 0 }
   0x6   :  { %10 = vsyncpa [#allocation7], 0 }
   0x7   :  { %11 = vsyncpa [#allocation6], 0 }
   0x8   :  { %13 = vsyncpa [#allocation6 + $0x1], 0  ;;  %s2075_s9 = smov 0   ;;  %s2077_s10 = smov 0  }
   0x9   :  { %s2079_s11 = smov 0   ;;  %s2081_s12 = smov 0  }
   0xa   :  { %s2083_s13 = smov 0   ;;  %s2085_s14 = smov 0  }
   0xb LB: > { %3385 = sst [smem:[#allocation13_spill]] %s2019_s9  ;;  %s1689_s15 = sadd.s32 4294967295, %s2039_s14   ;;  %s2039_s14 = sphi %s2085_s14, %s19_s14   ;;  %s2035_s13 = sphi %s2083_s13, %s3659_s13   ;;  %s2031_s12 = sphi %s2081_s12, %s3658_s12   ;;  %s2027_s11 = sphi %s2079_s11, %s3657_s11   ;;  %s2023_s10 = sphi %s2077_s10, %s3656_s10   ;;  %s2019_s9 = sphi %s2075_s9, %s3655_s9  }
   0xc   : > { %3386 = sst [smem:[#allocation14_spill]] %s2023_s10  ;;  %s1690_s16 = sadd.s32 4294967294, %s2039_s14  }
   0xd   : > { %3387 = sst [smem:[#allocation15_spill]] %s2027_s11  ;;  %p53_p0 = scmp.ne.s32.totalorder %s2023_s10, %s2019_s9 }
   0xe   : > { %3388 = sst [smem:[#allocation16_spill]] %s2031_s12  ;;  %p2109_p1 = scmp.eq.s32.totalorder %s1689_s15, 0 }
   0xf   : > { %3389 = sst [smem:[#allocation17_spill]] %s2035_s13  ;;  %p2113_p2 = scmp.eq.s32.totalorder %s1689_s15, 1 }
  0x10   : > { %3390 = sst [smem:[#allocation18_spill]] %s2039_s14  ;;  %p104_p3 = scmp.eq.s32.totalorder %s1690_s16, 1 }
  0x11   : > { %s3391_s17 = scalar_select %p2109_p1, 1, 0 }
  0x12   : > { %p2119_p4 = por %p2109_p1, %p53_p0  ;;  %p1691_p5 = scmp.ge.s32.totalorder %s2039_s14, 1 }
  0x13   : > { %p2124_p6 = por %p104_p3, %p53_p0  ;;  %p111_p7 = scmp.lt.s32.totalorder %s2039_s14, 3 }
  0x14   : > { %s3393_s19 = scalar_select %p2119_p4, 1, 0 }
  0x15   : > { %s3394_s20 = scalar_select %p2124_p6, 1, 0 }
  0x16   : > { %s3396_s1 = sld [smem:[#allocation82_spill]]  ;;  %p2132_p8 = pnand %p1691_p5, %p111_p7 }
  0x17   : > { %3395 = sst [smem:[#allocation19_spill]] %s3394_s20  ;;  %s31_s26 = sadd.s32 1, %s2035_s13 }
  0x18   : > { %p1818_p10 = pneg %p2132_p8  ;;  %s40_s27 = sadd.s32 1, %s2027_s11 }
  0x19   : > { %p33_p12 = scmp.ge.s32.totalorder %s31_s26, 2 }
  0x1a   : > { %p2141_p11 = pnand %p1818_p10, %p2109_p1 }
  0x1c   : > { %s124_s23 = sshll.u32 %s3396_s1, 4  ;;  %p1910_p0 = pneg %p2141_p11  ;;  %s125_s23 = int_to_ptr.vmem [resolvable:$true] %s124_s23 }
  0x1d   : > { %s1908_s28 = scalar_lea.vmem %s125_s23, 32  ;;  %p1916_p7 = scmp.lt.s32.totalorder %s125_s23, %s125_s23 }
  0x1e   : > { %p1909_p13 = scmp.ne.s32.totalorder %s125_s23, %s1908_s28  ;;  %p1917_p6 = scmp.lt.s32.totalorder %s1908_s28, %s1908_s28 }
  0x20   : > { %p1911_p3 = pnand %p1910_p0, %p1909_p13  ;;  %p1918_p9 = por %p1917_p6, %p1916_p7 }
  0x22   : > { %p1912_p5 = pneg %p1911_p3 }
  0x24   : > { %p1919_p4 = pnand %p1918_p9, %p1912_p5 }
  0x26   : > { %1922 = shalt.err (!%p1919_p4)
}
  0x27   : > { %s2041_s29 = smov [#allocation8]   ;;  %s3661_s26 = smov (%p33_p12, %s31_s26), 0 }
  0x28   : > { %1821 = dma.vmem_to_smem (!%p2141_p11), %s125_s23, 32, %s2041_s29, [#allocation7]  }
  0x29   : > { %3399 = sst [smem:[#allocation20_spill]] %s3661_s26  ;;  %p47_p10 = scmp.ne.s32.totalorder %s2027_s11, %s2023_s10 }
  0x2a   : > { %p48_p6 = scmp.eq.s32.totalorder %s2039_s14, 0  ;;  %s35_s30 = ssub.s32 %s2035_s13, %s3661_s26 }
  0x2b   : > { %p1831_p4 = scmp.lt.s32.totalorder %s2039_s14, 2  ;;  %p38_p9 = scmp.eq.s32.totalorder %s35_s30, 0 }
  0x2c   : > { %p49_p13 = por %p48_p6, %p47_p10  ;;  %p2161_p0 = por %p2113_p2, %p47_p10 }
  0x2d   : > { %s135_s4 = sand.u32 1, %s2027_s11   ;;  %s1808_s7 = sshll.u32 %s2035_s13, 7 }
  0x2e   : > { %s3400_s3 = scalar_select %p2161_p0, 1, 0 }
  0x2f   : > { %s2167_s5 = scalar_select %p38_p9, %s2027_s11, %s40_s27  }
  0x30   : > { %3401 = sst [smem:[#allocation21_spill]] %s3400_s3  ;;  %s1694_s6 = sshll.u32 %s135_s4, 3 }
  0x31   : > { %3402 = sst [smem:[#allocation22_spill]] %s2167_s5  ;;  %s3403_s0 = sld [smem:[#allocation81_spill]] }
  0x32   : > { %s139_s21 = scalar_lea.vmem [#allocation4], %s1694_s6  ;;  %p2177_p2 = pnand %p1831_p4, %p49_p13 }
  0x33   : > { %s149_s18 = sshll.u32 %s139_s21, 4  ;;  %s136_s23 = scalar_lea.sflag [#allocation5], %s135_s4  ;;  %s2175_s18 = int_to_ptr.vmem [resolvable:$true] %s149_s18 }
  0x34   : > { %p1925_p12 = pneg %p2177_p2 }
  0x37   : > { %s2173_s16 = scalar_lea.hbm %s3403_s0, %s1808_s7  ;;  %s1928_s29 = scalar_lea.hbm %s3403_s0, 256 }
  0x38   : > { %s1923_s25 = scalar_lea.hbm %s2173_s16, 128  ;;  %p1929_p7 = scmp.lt.u32.totalorder %s2173_s16, %s3403_s0 }
  0x39   : > { %p1924_p11 = scmp.ne.s32.totalorder %s2173_s16, %s1923_s25  ;;  %p1930_p10 = scmp.lt.u32.totalorder %s1928_s29, %s1923_s25 }
  0x3a   : > { %p1932_p4 = scmp.lt.u32.totalorder %s1923_s25, %s2173_s16 }
  0x3b   : > { %p1926_p3 = pnand %p1925_p12, %p1924_p11  ;;  %p1931_p6 = por %p1930_p10, %p1929_p7 }
  0x3d   : > { %p1927_p5 = pneg %p1926_p3  ;;  %p1933_p9 = por %p1932_p4, %p1931_p6 }
  0x3f   : > { %p1934_p13 = pnand %p1933_p9, %p1927_p5 }
  0x41   : > { %1937 = shalt.err (!%p1934_p13)
}
  0x42   : > { %s1938_s4 = scalar_lea.vmem %s2175_s18, 128  ;;  %s2042_s7 = smov [#allocation4]  }
  0x43   : > { %p1939_p11 = scmp.ne.s32.totalorder %s2175_s18, %s1938_s4  ;;  %s1943_s8 = sshll.u32 %s2042_s7, 4  ;;  %s1944_s8 = int_to_ptr.vmem [resolvable:$false] %s1943_s8 }
  0x44   : > { %s1945_s15 = scalar_lea.vmem %s1944_s8, 256  ;;  %p1946_p1 = scmp.lt.s32.totalorder %s2175_s18, %s1944_s8 }
  0x45   : > { %p1941_p3 = pnand %p1939_p11, %p1925_p12  ;;  %p1947_p7 = scmp.lt.s32.totalorder %s1945_s15, %s1938_s4 }
  0x47   : > { %p1942_p0 = pneg %p1941_p3  ;;  %p1948_p10 = por %p1947_p7, %p1946_p1 }
  0x49   : > { %p1949_p6 = pnand %p1948_p10, %p1942_p0 }
  0x4b   : > { %1952 = shalt.err (!%p1949_p6)
}
  0x4c   : > { %1825 = dma.hbm_to_vmem [thread:$0]  (!%p2177_p2), %s2173_s16, 128, %s2175_s18, %s136_s23  }
  0x4d   : > { %158 = sbr.rel (%p2132_p8) target bundleno = 744 (0x2e8), region = 28 }
  0x54   : > { %s2209_s21 = sand.u32 1, %s2023_s10   ;;  %p3406_p1 = scmp.ne.s32.totalorder %s3393_s19, 0 }
  0x55   : > { %3405 = sst [smem:[#allocation23_spill]] %s2209_s21  ;;  %s1698_s25 = sshll.u32 %s2209_s21, 3 }
  0x56   : > { %s161_s27 = scalar_lea.sflag [#allocation5], %s2209_s21  ;;  %s164_s28 = scalar_lea.vmem [#allocation4], %s1698_s25 }
  0x57   : > { %2006 = dma.done.wait (%p3406_p1), %s161_s27, 128  }
  0x58   : > { %2008 = vsyncadd (%p3406_p1), %s161_s27, 4294967168  ;;  %p3407_p0 = scmp.ne.s32.totalorder %s3391_s17, 0 }
  0x5a   : > { %2010 = dma.done.wait (%p3407_p0), [#allocation7], 32  }
  0x5b   : > { %2012 = vsyncadd (%p3407_p0), [#allocation7], 4294967264 }
  0x5c   : > { %173 = sfence }
  0x5d   : > { %v200_v0 = vld [vmem:[%s164_s28] sm:$0xff]  ;;  %vm208_vm0 = vcmask 1043456   ;;  %v194_v1 = vlaneseq  ;;  %v2043_v4 = vmov 0.0   ;;  %vm204_vm2 = vcmask 31744   ;;  %s2047_s17 = smov 2   ;;  %s2048_s19 = smov 3  }
  0x5e   : > { %v203_v2 = vcombine.high %v200_v0, %v200_v0  ;;  %v310_v3 = vsel %vm208_vm0, %v200_v0, -inf  ;;  %277 = vmatprep.mubr.f32.mxu0 %v2043_v4  ;;  %v2044_v8 = vmov -inf   ;;  %v2045_v11 = vmov 1.0   ;;  %s2049_s24 = smov 1   ;;  %s2050_s16 = smov 127  }
  0x5f   : > { %v311_v5 = vrot.slane %v310_v3, 4  ;;  %vm2223_vm1 = vcmp.lt.s32.totalorder %v194_v1, 256  ;;  %v2046_v16 = vmov 1966171168   ;;  %v291_v23 = vshrl.u32 %v194_v1, 7  ;;  %s2051_s18 = smov 126  }
  0x60   : > { %1701 = vmatprep.subr.msk.mxu0 %vm208_vm0, %v203_v2  ;;  %v317_v7 = vsel %vm208_vm0, %v203_v2, -inf  ;;  %198 = vst.msk [vmem:[#allocation2] sm:$0x3] %vm2223_vm1, %v2043_v4  ;;  %199 = vst.msk [vmem:[#allocation3] sm:$0x3] %vm2223_vm1, %v2044_v8  ;;  %v288_v17 = vunpack.c.l.s4 %v2046_v16  ;;  %vm372_vm3 = vcmask 1040384  }
  0x61   : > { %v312_v9 = vmax.f32 %v310_v3, %v311_v5  ;;  %v318_v10 = vrot.slane %v317_v7, 4  ;;  %1702 = vmatpush1.msk.msra.mxu0 %vm208_vm0, %v200_v0  ;;  %v357_v38 = vsub.s32 1, %v291_v23  ;;  %v353_v41 = vsub.s32 0, %v291_v23  ;;  %s2052_s22 = smov 125   ;;  %s2261_s23 = sld [smem:[#allocation8 + $0x3]] }
  0x62   : > { %1703 = vmatmul.mubr.msk.f32.vlgmr.msra.gmra.mrb[0].mxu0 %vm204_vm2, %v2045_v11  ;;  %v289_v22 = vunpack.c.0.s8 %v288_v17  ;;  %s2263_s29 = sld [smem:[#allocation8 + $0x83]]  ;;  %s2265_s30 = sld [smem:[#allocation8 + $0xa]]  ;;  %v2308_v49 = vand.u32 127, %v194_v1  ;;  %vm409_vm4 = vcmask 15360   ;;  %vm387_vm5 = vcmask 23552  }
  0x63   : > { %v313_v12 = vrot.slane %v312_v9, 2  ;;  %v319_v13 = vmax.f32 %v317_v7, %v318_v10  ;;  %s2267_s6 = sld [smem:[#allocation8 + $0x8a]]  ;;  %s2269_s4 = sld [smem:[#allocation8 + $0x11]]  ;;  %vm431_vm10 = vcmask 7168   ;;  %vm464_vm13 = vcmask 1039360  }
  0x64   : > { %v2235_v26 = vsub.s32 %v289_v22, %v291_v23  ;;  %s2271_s7 = sld [smem:[#allocation8 + $0x91]]  ;;  %s2273_s8 = sld [smem:[#allocation8 + $0x1f]]  ;;  %v2328_v51 = vadd.s32 128, %v2308_v49  ;;  %v2358_v63 = vand.u32 15, %v2308_v49  ;;  %vm486_vm0 = vcmask 1031168  }
  0x65   : > { %v314_v14 = vmax.f32 %v312_v9, %v313_v12  ;;  %v320_v15 = vrot.slane %v319_v13, 2  ;;  %s2275_s15 = sld [smem:[#allocation8 + $0x9f]]  ;;  %s2277_s25 = sld [smem:[#allocation8 + $0x26]] }
  0x66   : > { %s2279_s27 = sld [smem:[#allocation8 + $0xa6]]  ;;  %s2281_s28 = sld [smem:[#allocation8 + $0x2d]]  ;;  %v2361_v0 = vand.u32 15, %v2328_v51  ;;  %vm414_vm6 = vcmp.ge.s32.totalorder %v2358_v63, 2  ;;  %vm392_vm8 = vcmp.ge.s32.totalorder %v2358_v63, 3  ;;  %vm436_vm11 = vcmp.ge.s32.totalorder %v2358_v63, 1 }
  0x67   : > { %v315_v18 = vrot.slane %v314_v14, 1  ;;  %v321_v19 = vmax.f32 %v319_v13, %v320_v15  ;;  %v308_v28 = vld [vmem:[#allocation3] sm:$0x3]  ;;  %v201_v35 = vld [vmem:[#allocation2] sm:$0x3]  ;;  %s2295_s0 = sld [smem:[#allocation8 + $0x2]]  ;;  %v581_v52 = vstv %s2261_s23 }
  0x68   : > { %s2297_s1 = sld [smem:[#allocation8 + $0x82]]  ;;  %s2299_s26 = sld [smem:[#allocation8 + $0x4]]  ;;  %v585_v50 = vstv %s2263_s29  ;;  %v729_v53 = vstv %s2265_s30  ;;  %vm415_vm7 = vcmp.ge.s32.totalorder %v2361_v0, 2  ;;  %vm393_vm9 = vcmp.ge.s32.totalorder %v2361_v0, 3 }
  0x69   : > { %v316_v20 = vmax.f32 %v314_v14, %v315_v18  ;;  %v322_v21 = vrot.slane %v321_v19, 1  ;;  %s2301_s13 = sld [smem:[#allocation8 + $0x84]]  ;;  %s2303_s5 = sld [smem:[#allocation8 + $0x5]]  ;;  %v733_v54 = vstv %s2267_s6  ;;  %v877_v56 = vstv %s2269_s4 }
  0x6a   : > { %s2305_s11 = sld [smem:[#allocation8 + $0x87]]  ;;  %s2310_s10 = sld [smem:[#allocation8 + $0x85]]  ;;  %v881_v57 = vstv %s2271_s7  ;;  %v1161_v58 = vstv %s2273_s8  ;;  %vm437_vm12 = vcmp.ge.s32.totalorder %v2361_v0, 1  ;;  %vm472_vm14 = vcmp.lt.s32.totalorder %v2358_v63, 15 }
  0x6b   : > { %v323_v24 = vmax.f32 %v321_v19, %v322_v21  ;;  %s2312_s14 = sld [smem:[#allocation8 + $0x8]]  ;;  %s2314_s20 = sld [smem:[#allocation8 + $0x6]]  ;;  %v1165_v59 = vstv %s2275_s15  ;;  %v1309_v60 = vstv %s2277_s25  ;;  %vm473_vm15 = vcmp.lt.s32.totalorder %v2361_v0, 15 }
  0x6c   : > { %3410 = sst [smem:[#allocation24_spill]] %s2281_s28  ;;  %s2316_s9 = sld [smem:[#allocation8 + $0x86]]  ;;  %v1313_v61 = vstv %s2279_s27  ;;  %v3357_v62 = vstv %s2281_s28  ;;  %vm494_vm2 = vcmp.lt.s32.totalorder %v2358_v63, 14 }
  0x6d   : > { %v326_v25 = vcombine.low %v316_v20, %v323_v24  ;;  %3416 = sst [smem:[#allocation30_spill]] %s2295_s0  ;;  %s2318_s2 = sld [smem:[#allocation8 + $0x88]]  ;;  %v563_v9 = vstv %s2295_s0 }
  0x6e   : > { %3417 = sst [smem:[#allocation31_spill]] %s2297_s1  ;;  %s2320_s3 = sld [smem:[#allocation8 + $0x9]]  ;;  %v567_v12 = vstv %s2297_s1  ;;  %v599_v16 = vstv %s2299_s26 }
  0x6f   : > { %v333_v27 = vrot.slane %v326_v25, %v2235_v26  ;;  %3418 = sst [smem:[#allocation32_spill]] %s2299_s26  ;;  %s2323_s12 = sld [smem:[#allocation8 + $0x89]]  ;;  %v603_v17 = vstv %s2301_s13 }
  0x70   : > { %3419 = sst [smem:[#allocation33_spill]] %s2301_s13  ;;  %s2325_s21 = sld [smem:[#allocation8 + $0xe]]  ;;  %v679_v21 = vstv %s2305_s11 }
  0x71   : > { %v340_v29 = vrot.slane %v333_v27, %v2235_v26  ;;  %3420 = sst [smem:[#allocation34_spill]] %s2303_s5  ;;  %s2337_s29 = sld [smem:[#allocation8 + $0xc]] }
  0x72   : > { %3421 = sst [smem:[#allocation35_spill]] %s2305_s11  ;;  %s2349_s23 = sld [smem:[#allocation8 + $0xd]] }
  0x73   : > { %v342_v30 = vmax.f32 %v308_v28, %v340_v29  ;;  %3422 = sst [smem:[#allocation36_spill]] %s2310_s10  ;;  %s2364_s6 = sld [smem:[#allocation8 + $0x8d]]  ;;  %v617_v29 = vstv %s2303_s5 }
  0x74   : > { %3423 = sst [smem:[#allocation37_spill]] %s2312_s14  ;;  %s2330_s14 = sld [smem:[#allocation8 + $0xb]] }
  0x75   : > { %343 = vst.msk [vmem:[#allocation3] sm:$0x3] %vm2223_vm1, %v342_v30  ;;  %3424 = sst [smem:[#allocation38_spill]] %s2314_s20  ;;  %s2351_s30 = sld [smem:[#allocation8 + $0x8f]] }
  0x76   : > { %3425 = sst [smem:[#allocation39_spill]] %s2316_s9  ;;  %s2332_s9 = sld [smem:[#allocation8 + $0x8b]] }
  0x77   : > { %3426 = sst [smem:[#allocation40_spill]] %s2318_s2  ;;  %s2366_s7 = sld [smem:[#allocation8 + $0x10]] }
  0x78   : > { %3427 = sst [smem:[#allocation41_spill]] %s2320_s3  ;;  %s2344_s3 = sld [smem:[#allocation8 + $0xf]] }
  0x79   : > { %3428 = sst [smem:[#allocation42_spill]] %s2323_s12  ;;  %s2339_s12 = sld [smem:[#allocation8 + $0x8c]] }
  0x7a   : > { %3429 = sst [smem:[#allocation43_spill]] %s2325_s21  ;;  %s2373_s15 = sld [smem:[#allocation8 + $0x90]] }
  0x7b   : > { %3430 = sst [smem:[#allocation44_spill]] %s2330_s14  ;;  %s2342_s21 = sld [smem:[#allocation8 + $0x8e]] }
  0x7c   : > { %v349_v39 = vld [vmem:[#allocation3] sm:$0x3]  ;;  %3431 = sst [smem:[#allocation45_spill]] %s2332_s9  ;;  %s2375_s27 = sld [smem:[#allocation8 + $0x12]] }
  0x7d   : > { %v369_v42 = vrot.slane %v349_v39, %v357_v38  ;;  %v365_v45 = vrot.slane %v349_v39, %v353_v41  ;;  %3432 = sst [smem:[#allocation46_spill]] %s2337_s29  ;;  %s2398_s0 = sld [smem:[#allocation8 + $0x1d]] }
  0x7e   : > { %3435 = sst [smem:[#allocation49_spill]] %s2344_s3  ;;  %s2404_s26 = sld [smem:[#allocation8 + $0x9d]] }
  0x7f   : > { %3433 = sst [smem:[#allocation47_spill]] %s2339_s12  ;;  %s2401_s1 = sld [smem:[#allocation8 + $0x14]] }
  0x80   : > { %3436 = sst [smem:[#allocation50_spill]] %s2349_s23  ;;  %s2409_s13 = sld [smem:[#allocation8 + $0x94]] }
  0x81   : > { %3434 = sst [smem:[#allocation48_spill]] %s2342_s21  ;;  %s3448_s11 = sld [smem:[#allocation37_spill]] }
  0x82   : > { %3437 = sst [smem:[#allocation51_spill]] %s2351_s30  ;;  %s2428_s5 = sld [smem:[#allocation8 + $0xa0]] }
  0x83   : > { %3438 = sst [smem:[#allocation52_spill]] %s2364_s6  ;;  %s3459_s4 = sld [smem:[#allocation42_spill]] }
  0x84   : > { %3439 = sst [smem:[#allocation53_spill]] %s2366_s7  ;;  %s2382_s7 = sld [smem:[#allocation8 + $0x1c]] }
  0x85   : > { %3440 = sst [smem:[#allocation54_spill]] %s2373_s15  ;;  %s2486_s8 = sld [smem:[#allocation8 + $0x27]] }
  0x86   : > { %3441 = sst [smem:[#allocation55_spill]] %s2375_s27  ;;  %s2497_s25 = sld [smem:[#allocation8 + $0x28]] }
  0x87   : > { %3444 = sst [smem:[#allocation58_spill]] %s2398_s0  ;;  %s2531_s3 = sld [smem:[#allocation8 + $0x2c]] }
  0x88   : > { %3445 = sst [smem:[#allocation59_spill]] %s2401_s1  ;;  %s2551_s15 = sld [smem:[#allocation8 + $0x2f]] }
  0x89   : > { %3446 = sst [smem:[#allocation60_spill]] %s2404_s26  ;;  %s2416_s1 = sld [smem:[#allocation8 + $0x9e]] }
  0x8a   : > { %3442 = sst [smem:[#allocation56_spill]] %s2382_s7  ;;  %s3473_s21 = sld [smem:[#allocation59_spill]] }
  0x8b   : > { %s2418_s26 = sld [smem:[#allocation8 + $0x23]]  ;;  %3452 = sst [smem:[#allocation65_spill]] %s2428_s5 }
  0x8c   : > { %s2446_s5 = sld [smem:[#allocation8 + $0xa3]]  ;;  %3464 = sst [smem:[#allocation73_spill]] %s2497_s25 }
  0x8d   : > { %3463 = sst [smem:[#allocation72_spill]] %s2486_s8  ;;  %s3474_s23 = sld [smem:[#allocation60_spill]] }
  0x8e   : > { %3472 = sst [smem:[#allocation80_spill]] %s2531_s3  ;;  %s2543_s3 = sld [smem:[#allocation8 + $0x2e]] }
  0x8f   : > { %3449 = sst [smem:[#allocation62_spill]] %s2416_s1  ;;  %s2585_s8 = sld [smem:[#allocation8 + $0xaf]] }
  0x90   : > { %s2440_s1 = sld [smem:[#allocation8 + $0xa1]]  ;;  %s3519_s30 = sld [smem:[#allocation50_spill]] }
  0x91   : > { %3450 = sst [smem:[#allocation63_spill]] %s2418_s26  ;;  %s3476_s28 = sld [smem:[#allocation62_spill]] }
  0x92   : > { %s3453_s26 = sld [smem:[#allocation39_spill]]  ;;  %3455 = sst [smem:[#allocation67_spill]] %s2446_s5 }
  0x93   : > { %s2465_s5 = sld [smem:[#allocation8 + $0x25]]  ;;  %s3523_s25 = sld [smem:[#allocation51_spill]] }
  0x94   : > { %3481 = sst [smem:[#allocation60_spill]] %s2543_s3  ;;  %s3525_s3 = sld [smem:[#allocation54_spill]] }
  0x95   : > { %s2054_s0 = smov 32  }
  0x96   : > { %3454 = sst [smem:[#allocation66_spill]] %s2440_s1  ;;  %s2457_s1 = sld [smem:[#allocation8 + $0xa4]] }
  0x9c   : > { %3458 = sst [smem:[#allocation69_spill]] %s2457_s1  ;;  %s2472_s1 = sld [smem:[#allocation8 + $0xa5]] }
  0x9d   : > { %s3487_s7 = sld [smem:[#allocation69_spill]] }
  0xa2   : > { %3460 = sst [smem:[#allocation70_spill]] %s2472_s1  ;;  %s2488_s1 = sld [smem:[#allocation8 + $0xa7]] }
 0x135   : > { %v279_v31 = vpop.f32.mrb[0].mxu0 }
 0x136   : > { %v281_v32 = vpop.f32.mrb[1].mxu0 }
 0x137   : > { %v286_v33 = vcombine.low %v279_v31, %v281_v32 }
 0x139   : > { %v293_v34 = vrot.slane %v286_v33, %v2235_v26  ;;  %v621_v33 = vstv %s2310_s10  ;;  %s2438_s10 = sld [smem:[#allocation8 + $0x21]] }
 0x13b   : > { %v300_v36 = vrot.slane %v293_v34, %v2235_v26 }
 0x13d   : > { %v302_v37 = vadd.f32 %v300_v36, %v201_v35 }
 0x13f   : > { %307 = vst.msk [vmem:[#allocation2] sm:$0x3] %vm2223_vm1, %v302_v37 }
 0x146   : > { %v347_v40 = vld [vmem:[#allocation2] sm:$0x3] }
 0x147   : > { %v348_v43 = vmul.f32 0.25, %v347_v40 }
 0x149   : > { %v358_v44 = vrot.slane %v348_v43, %v357_v38  ;;  %v354_v46 = vrot.slane %v348_v43, %v353_v41  ;;  %v693_v38 = vstv %s3448_s11  ;;  %v635_v41 = vstv %s2314_s20  ;;  %s2455_s11 = sld [smem:[#allocation8 + $0x22]]  ;;  %s3457_s20 = sld [smem:[#allocation41_spill]] }
 0x14b   : > { %v2245_v47 = vsel %vm372_vm3, %v358_v44, %v369_v42  ;;  %v2249_v48 = vsel %vm372_vm3, %v354_v46, %v365_v45  ;;  %vm495_vm3 = vcmp.lt.s32.totalorder %v2361_v0, 14 }
 0x14c   : > { %404 = vrot.lane.b32.xlu1 %v2245_v47, %s2047_s17  ;;  %381 = vrot.lane.b32.xlu0 %v2245_v47, %s2048_s19  ;;  %v587_v55 = vmul.f32 %v585_v50, %v2245_v47  ;;  %v586_v5 = vmul.f32 %v585_v50, %v2249_v48  ;;  %v735_v7 = vmul.f32 %v733_v54, %v2245_v47 }
 0x14d   : > { %v583_v13 = vmul.f32 %v581_v52, %v2245_v47  ;;  %v582_v14 = vmul.f32 %v581_v52, %v2249_v48  ;;  %v734_v15 = vmul.f32 %v733_v54, %v2249_v48  ;;  %v731_v18 = vmul.f32 %v729_v53, %v2245_v47 }
 0x14e   : > { %v591_v10 = vrot.slane %v587_v55, 1  ;;  %v883_v19 = vmul.f32 %v881_v57, %v2245_v47  ;;  %v590_v20 = vrot.slane %v586_v5, 1  ;;  %v739_v22 = vrot.slane %v735_v7, 1 }
 0x14f   : > { %v882_v23 = vmul.f32 %v881_v57, %v2249_v48  ;;  %v730_v25 = vmul.f32 %v729_v53, %v2249_v48  ;;  %v1166_v27 = vmul.f32 %v1165_v59, %v2249_v48  ;;  %v1167_v28 = vmul.f32 %v1165_v59, %v2245_v47 }
 0x150   : > { %407 = vrot.lane.b32.xlu1 %v2249_v48, %s2047_s17  ;;  %385 = vrot.lane.b32.xlu0 %v2249_v48, %s2048_s19  ;;  %s2283_s17 = sld [smem:[#allocation8]]  ;;  %s2285_s19 = sld [smem:[#allocation8 + $0xad]]  ;;  %v2406_v24 = vadd.f32 %v591_v10, %v583_v13  ;;  %v738_v30 = vrot.slane %v734_v15, 1  ;;  %v1314_v31 = vmul.f32 %v1313_v61, %v2249_v48  ;;  %v1315_v32 = vmul.f32 %v1313_v61, %v2245_v47 }
 0x151   : > { %v879_v34 = vmul.f32 %v877_v56, %v2245_v47  ;;  %v887_v35 = vrot.slane %v883_v19, 1  ;;  %v2433_v37 = vadd.f32 %v590_v20, %v582_v14  ;;  %v2436_v39 = vadd.f32 %v739_v22, %v731_v18 }
 0x152   : > { %v886_v40 = vrot.slane %v882_v23, 1  ;;  %v878_v42 = vmul.f32 %v877_v56, %v2249_v48  ;;  %v1170_v43 = vrot.slane %v1166_v27, 1  ;;  %v1171_v44 = vrot.slane %v1167_v28, 1 }
 0x153   : > { %v2450_v45 = vadd.f32 %v738_v30, %v730_v25  ;;  %v1162_v46 = vmul.f32 %v1161_v58, %v2249_v48  ;;  %v1318_v50 = vrot.slane %v1314_v31, 1  ;;  %v1319_v52 = vrot.slane %v1315_v32, 1 }
 0x154   : > { %429 = vrot.lane.b32.xlu1 %v2249_v48, %s2049_s24  ;;  %426 = vrot.lane.b32.xlu0 %v2245_v47, %s2049_s24  ;;  %s2287_s24 = sld [smem:[#allocation8 + $0x80]]  ;;  %v639_v53 = vstv %s3453_s26  ;;  %v697_v54 = vstv %s2318_s2  ;;  %v2461_v55 = vadd.f32 %v887_v35, %v879_v34  ;;  %v2467_v57 = vadd.f32 %v886_v40, %v878_v42  ;;  %s2480_s26 = sld [smem:[#allocation8 + $0x2a]] }
 0x155   : > { %v1163_v59 = vmul.f32 %v1161_v58, %v2245_v47  ;;  %v1310_v61 = vmul.f32 %v1309_v60, %v2249_v48  ;;  %v1311_v5 = vmul.f32 %v1309_v60, %v2245_v47  ;;  %v711_v7 = vstv %s3457_s20  ;;  %s2511_s20 = sld [smem:[#allocation8 + $0xaa]]  ;;  %s2529_s2 = sld [smem:[#allocation8 + $0xa9]] }
 0x156   : > { %3411 = sst [smem:[#allocation25_spill]] %s2283_s17  ;;  %v527_v1 = vstv %s2283_s17  ;;  %v1461_v2 = vstv %s2285_s19  ;;  %s2380_s17 = sld [smem:[#allocation8 + $0x92]]  ;;  %v715_v10 = vstv %s3459_s4  ;;  %v2484_v13 = vadd.f32 %v1170_v43, %v1162_v46 }
 0x157   : > { %v1462_v36 = vmul.f32 %v1461_v2, %v2249_v48  ;;  %v1458_v58 = vmul.f32 %v3357_v62, %v2249_v48  ;;  %v2493_v14 = vadd.f32 %v1171_v44, %v1163_v59  ;;  %v2495_v60 = vadd.f32 %v1318_v50, %v1310_v61  ;;  %s2499_s4 = sld [smem:[#allocation8 + $0xa8]]  ;;  %s2521_s19 = sld [smem:[#allocation8 + $0x29]] }
 0x158   : > { %462 = vrot.lane.b32.xlu1 %v2245_v47, %s2050_s16  ;;  %460 = vrot.lane.b32.xlu0 %v2249_v48, %s2050_s16  ;;  %s2289_s16 = sld [smem:[#allocation8 + $0x1]]  ;;  %v2501_v15 = vadd.f32 %v1319_v52, %v1311_v5  ;;  %v2506_v18 = vmul.f32 %v1461_v2, %v2245_v47  ;;  %v747_v19 = vstv %s2330_s14  ;;  %v751_v20 = vstv %s2332_s9  ;;  %s2523_s14 = sld [smem:[#allocation8 + $0xab]] }
 0x159   : > { %v1466_v56 = vrot.slane %v1462_v36, 1  ;;  %v765_v25 = vstv %s2337_s29  ;;  %v769_v27 = vstv %s2339_s12  ;;  %v787_v31 = vstv %s2364_s6  ;;  %s2541_s12 = sld [smem:[#allocation8 + $0xac]]  ;;  %s2053_s29 = smov 48  }
 0x15a   : > { %3412 = sst [smem:[#allocation26_spill]] %s2287_s24  ;;  %v531_v3 = vstv %s2287_s24  ;;  %s2390_s24 = sld [smem:[#allocation8 + $0x93]] }
 0x15b   : > { %3462 = sst [smem:[#allocation71_spill]] %s2480_s26  ;;  %s2513_s26 = sld [smem:[#allocation8 + $0x2b]]  ;;  %v2515_v23 = vadd.f32 %v1466_v56, %v1458_v58 }
 0x15c   : > { %484 = vrot.lane.b32.xlu1 %v2245_v47, %s2051_s18  ;;  %482 = vrot.lane.b32.xlu0 %v2249_v48, %s2051_s18  ;;  %s2291_s18 = sld [smem:[#allocation8 + $0x81]]  ;;  %3467 = sst [smem:[#allocation75_spill]] %s2511_s20 }
 0x15d   : > { %3465 = sst [smem:[#allocation74_spill]] %s2499_s4  ;;  %s2591_s20 = sld [smem:[#allocation8 + $0x30]] }
 0x15e   : > { %3413 = sst [smem:[#allocation27_spill]] %s2289_s16  ;;  %v545_v4 = vstv %s2289_s16  ;;  %s2388_s16 = sld [smem:[#allocation8 + $0x13]] }
 0x15f   : > { %3469 = sst [smem:[#allocation77_spill]] %s2521_s19  ;;  %s2549_s19 = sld [smem:[#allocation8 + $0xae]] }
 0x160   : > { %506 = vrot.lane.b32.xlu1 %v2245_v47, %s2052_s22  ;;  %504 = vrot.lane.b32.xlu0 %v2249_v48, %s2052_s22  ;;  %s2293_s22 = sld [smem:[#allocation8 + $0x7]]  ;;  %3470 = sst [smem:[#allocation78_spill]] %s2523_s14 }
 0x161   : > { %3468 = sst [smem:[#allocation76_spill]] %s2513_s26  ;;  %s3482_s14 = sld [smem:[#allocation66_spill]] }
 0x162   : > { %3414 = sst [smem:[#allocation28_spill]] %s2291_s18  ;;  %v549_v8 = vstv %s2291_s18  ;;  %s2411_s18 = sld [smem:[#allocation8 + $0x1e]] }
 0x163   : > { %3471 = sst [smem:[#allocation79_spill]] %s2529_s2  ;;  %s3483_s2 = sld [smem:[#allocation67_spill]] }
 0x164   : > { %3443 = sst [smem:[#allocation57_spill]] %s2388_s16  ;;  %s3488_s16 = sld [smem:[#allocation70_spill]] }
 0x165   : > { %3479 = sst [smem:[#allocation59_spill]] %s2541_s12  ;;  %s3524_s12 = sld [smem:[#allocation49_spill]] }
 0x166   : > { %3415 = sst [smem:[#allocation29_spill]] %s2293_s22  ;;  %v675_v11 = vstv %s2293_s22  ;;  %s2396_s22 = sld [smem:[#allocation8 + $0x9c]] }
 0x167   : > { %3484 = sst [smem:[#allocation62_spill]] %s2549_s19  ;;  %s2730_s19 = sld [smem:[#allocation8 + $0xb0]] }
 0x168   : > { %3447 = sst [smem:[#allocation61_spill]] %s2411_s18  ;;  %s3522_s6 = sld [smem:[#allocation43_spill]] }
 0x169   : > { %s2426_s18 = sld [smem:[#allocation8 + $0x20]]  ;;  %3486 = sst [smem:[#allocation66_spill]] %s2551_s15 }
 0x16a   : > { %3494 = sst [smem:[#allocation67_spill]] %s2585_s8  ;;  %s3530_s9 = sld [smem:[#allocation53_spill]] }
 0x16b   : > { %s3535_s8 = sld [smem:[#allocation57_spill]]  ;;  %s3549_s15 = sld [smem:[#allocation56_spill]] }
 0x16c   : > { %s2055_s26 = smov 16   ;;  %s3621_s4 = sld [smem:[#allocation67_spill]] }
 0x16f   : > { %3451 = sst [smem:[#allocation64_spill]] %s2426_s18  ;;  %s2448_s18 = sld [smem:[#allocation8 + $0x24]] }
 0x175   : > { %3456 = sst [smem:[#allocation68_spill]] %s2448_s18  ;;  %s2463_s18 = sld [smem:[#allocation8 + $0xa2]] }
 0x176   : > { %s3485_s27 = sld [smem:[#allocation68_spill]] }
 0x177   : > { %3499 = sst [smem:[#allocation68_spill]] %s2591_s20  ;;  %s3558_s20 = sld [smem:[#allocation61_spill]] }
 0x1be   : > { %v405_v5 = vpop.permute.xlu1 %404  ;;  %v382_v52 = vpop.permute.xlu0 %381 }
 0x1c2   : > { %v408_v56 = vpop.permute.xlu1 %407  ;;  %v386_v42 = vpop.permute.xlu0 %385 }
 0x1c3   : > { %v410_v34 = vsel %vm409_vm4, %v408_v56, %v405_v5  ;;  %v413_v50 = vsel %vm409_vm4, %v405_v5, %v408_v56  ;;  %v388_v36 = vsel %vm387_vm5, %v386_v42, %v382_v52  ;;  %v391_v43 = vsel %vm387_vm5, %v382_v52, %v386_v42 }
 0x1c4   : > { %v2599_v62 = vsel %vm414_vm6, %v413_v50, 0.0  ;;  %v2603_v59 = vsel %vm415_vm7, %v410_v34, 0.0  ;;  %v2607_v61 = vsel %vm392_vm8, %v391_v43, 0.0  ;;  %v2611_v56 = vsel %vm393_vm9, %v388_v36, 0.0 }
 0x1c5   : > { %v529_v42 = vmul.f32 %v527_v1, %v2611_v56  ;;  %v533_v34 = vmul.f32 %v531_v3, %v2611_v56  ;;  %v547_v50 = vmul.f32 %v545_v4, %v2603_v59  ;;  %v551_v43 = vmul.f32 %v549_v8, %v2603_v59 }
 0x1c6   : > { %v430_v52 = vpop.permute.xlu1 %429  ;;  %v427_v36 = vpop.permute.xlu0 %426  ;;  %v528_v5 = vmul.f32 %v527_v1, %v2607_v61  ;;  %v532_v44 = vmul.f32 %v531_v3, %v2607_v61  ;;  %v546_v58 = vmul.f32 %v545_v4, %v2599_v62  ;;  %v550_v46 = vmul.f32 %v549_v8, %v2599_v62 }
 0x1c7   : > { %v432_v40 = vsel %vm431_vm10, %v430_v52, %v427_v36  ;;  %v435_v35 = vsel %vm431_vm10, %v427_v36, %v430_v52  ;;  %v537_v30 = vrot.slane %v533_v34, 1  ;;  %v555_v32 = vrot.slane %v551_v43, 1 }
 0x1c8   : > { %v2643_v1 = vsel %vm436_vm11, %v435_v35, 0.0  ;;  %v2647_v3 = vsel %vm437_vm12, %v432_v40, 0.0  ;;  %vm508_vm4 = vcmask 1022976   ;;  %v536_v4 = vrot.slane %v532_v44, 1 }
 0x1c9   : > { %v554_v8 = vrot.slane %v550_v46, 1  ;;  %vm516_vm5 = vcmp.lt.s32.totalorder %v2358_v63, 13  ;;  %vm517_vm6 = vcmp.lt.s32.totalorder %v2361_v0, 13  ;;  %v541_v34 = vadd.f32 %v537_v30, %v529_v42 }
 0x1ca   : > { %v559_v43 = vadd.f32 %v555_v32, %v547_v50  ;;  %v569_v35 = vmul.f32 %v567_v12, %v2647_v3  ;;  %v463_v36 = vpop.permute.xlu1 %462  ;;  %v461_v22 = vpop.permute.xlu0 %460  ;;  %v540_v40 = vadd.f32 %v536_v4, %v528_v5  ;;  %v568_v44 = vmul.f32 %v567_v12, %v2643_v1 }
 0x1cb   : > { %v558_v28 = vadd.f32 %v554_v8, %v546_v58  ;;  %v465_v2 = vsel %vm464_vm13, %v461_v22, %v463_v36  ;;  %v469_v30 = vsel %vm464_vm13, %v463_v36, %v461_v22  ;;  %v565_v32 = vmul.f32 %v563_v9, %v2647_v3 }
 0x1cc   : > { %v573_v42 = vrot.slane %v569_v35, 1  ;;  %v2666_v50 = vsel %vm472_vm14, %v465_v2, 0.0  ;;  %v2670_v58 = vsel %vm473_vm15, %v469_v30, 0.0  ;;  %v564_v12 = vmul.f32 %v563_v9, %v2643_v1 }
 0x1cd   : > { %v572_v5 = vrot.slane %v568_v44, 1  ;;  %v561_v4 = vadd.f32 %v559_v43, %v541_v34  ;;  %v605_v22 = vmul.f32 %v603_v17, %v2670_v58  ;;  %v560_v36 = vadd.f32 %v558_v28, %v540_v40 }
 0x1ce   : > { %v577_v8 = vadd.f32 %v573_v42, %v565_v32  ;;  %v485_v46 = vpop.permute.xlu1 %484  ;;  %v483_v35 = vpop.permute.xlu0 %482  ;;  %v601_v2 = vmul.f32 %v599_v16, %v2670_v58  ;;  %v600_v30 = vmul.f32 %v599_v16, %v2666_v50  ;;  %v604_v9 = vmul.f32 %v603_v17, %v2666_v50 }
 0x1cf   : > { %v576_v52 = vadd.f32 %v572_v5, %v564_v12  ;;  %v487_v34 = vsel %vm486_vm0, %v483_v35, %v485_v46  ;;  %v491_v43 = vsel %vm486_vm0, %v485_v46, %v483_v35  ;;  %v609_v40 = vrot.slane %v605_v22, 1 }
 0x1d0   : > { %v579_v28 = vadd.f32 %v577_v8, %v561_v4  ;;  %v2691_v44 = vsel %vm494_vm2, %v487_v34, 0.0  ;;  %v2695_v32 = vsel %vm495_vm3, %v491_v43, 0.0  ;;  %v608_v42 = vrot.slane %v604_v9, 1 }
 0x1d1   : > { %v578_v16 = vadd.f32 %v576_v52, %v560_v36  ;;  %v613_v12 = vadd.f32 %v609_v40, %v601_v2  ;;  %v623_v46 = vmul.f32 %v621_v33, %v2695_v32  ;;  %v677_v5 = vmul.f32 %v675_v11, %v2611_v56 }
 0x1d2   : > { %v597_v17 = vadd.f32 %v2406_v24, %v579_v28  ;;  %v507_v4 = vpop.permute.xlu1 %506  ;;  %v505_v8 = vpop.permute.xlu0 %504  ;;  %v612_v35 = vadd.f32 %v608_v42, %v600_v30  ;;  %v622_v52 = vmul.f32 %v621_v33, %v2691_v44  ;;  %v681_v24 = vmul.f32 %v679_v21, %v2611_v56 }
 0x1d3   : > { %v596_v22 = vadd.f32 %v2433_v37, %v578_v16  ;;  %v509_v36 = vsel %vm508_vm4, %v505_v8, %v507_v4  ;;  %v513_v2 = vsel %vm508_vm4, %v507_v4, %v505_v8  ;;  %v619_v9 = vmul.f32 %v617_v29, %v2695_v32 }
 0x1d4   : > { %v627_v34 = vrot.slane %v623_v46, 1  ;;  %v2718_v37 = vsel %vm516_vm5, %v509_v36, 0.0  ;;  %v2722_v33 = vsel %vm517_vm6, %v513_v2, 0.0  ;;  %v618_v30 = vmul.f32 %v617_v29, %v2691_v44 }
 0x1d5   : > { %v626_v43 = vrot.slane %v622_v52, 1  ;;  %v615_v28 = vadd.f32 %v613_v12, %v597_v17  ;;  %v641_v16 = vmul.f32 %v639_v53, %v2722_v33  ;;  %v614_v63 = vadd.f32 %v612_v35, %v596_v22 }
 0x1d6   : > { %v631_v40 = vadd.f32 %v627_v34, %v619_v9  ;;  %v637_v0 = vmul.f32 %v635_v41, %v2722_v33  ;;  %v640_v46 = vmul.f32 %v639_v53, %v2718_v37  ;;  %v685_v29 = vrot.slane %v681_v24, 1 }
 0x1d7   : > { %v630_v42 = vadd.f32 %v626_v43, %v618_v30  ;;  %v645_v4 = vrot.slane %v641_v16, 1  ;;  %v636_v17 = vmul.f32 %v635_v41, %v2718_v37  ;;  %v695_v12 = vmul.f32 %v693_v38, %v2603_v59 }
 0x1d8   : > { %v699_v8 = vmul.f32 %v697_v54, %v2603_v59  ;;  %v633_v22 = vadd.f32 %v631_v40, %v615_v28  ;;  %v644_v35 = vrot.slane %v640_v46, 1  ;;  %v713_v52 = vmul.f32 %v711_v7, %v2647_v3 }
 0x1d9   : > { %v717_v53 = vmul.f32 %v715_v10, %v2647_v3  ;;  %v649_v24 = vadd.f32 %v645_v4, %v637_v0  ;;  %v689_v36 = vadd.f32 %v685_v29, %v677_v5  ;;  %v753_v41 = vmul.f32 %v751_v20, %v2670_v58 }
 0x1da   : > { %v703_v2 = vrot.slane %v699_v8, 1  ;;  %v632_v9 = vadd.f32 %v630_v42, %v614_v63  ;;  %v648_v34 = vadd.f32 %v644_v35, %v636_v17  ;;  %v771_v43 = vmul.f32 %v769_v27, %v2695_v32 }
 0x1db   : > { %v721_v30 = vrot.slane %v717_v53, 1  ;;  %v651_v28 = vadd.f32 %v649_v24, %v633_v22  ;;  %v749_v16 = vmul.f32 %v747_v19, %v2670_v58  ;;  %v757_v5 = vrot.slane %v753_v41, 1 }
 0x1dc   : > { %v707_v40 = vadd.f32 %v703_v2, %v695_v12  ;;  %v650_v0 = vadd.f32 %v648_v34, %v632_v9  ;;  %v775_v29 = vrot.slane %v771_v43, 1  ;;  %v789_v63 = vmul.f32 %v787_v31, %v2722_v33 }
 0x1dd   : > { %v725_v46 = vadd.f32 %v721_v30, %v713_v52  ;;  %653 = vrot.lane.b32.xlu0 %v651_v28, %s2053_s29  ;;  %v767_v4 = vmul.f32 %v765_v25, %v2695_v32  ;;  %v680_v17 = vmul.f32 %v679_v21, %v2607_v61  ;;  %v1515_v12 = vstv %s2730_s19  ;;  %s2058_s19 = smov 80  }
 0x1de   : > { %v709_v42 = vadd.f32 %v707_v40, %v689_v36  ;;  %657 = vrot.lane.b32.xlu1 %v650_v0, %s2053_s29  ;;  %v761_v8 = vadd.f32 %v757_v5, %v749_v16  ;;  %v3520_v22 = vstv %s3519_s30  ;;  %v793_v52 = vrot.slane %v789_v63, 1  ;;  %s3521_s29 = sld [smem:[#allocation48_spill]]  ;;  %s3533_s30 = sld [smem:[#allocation55_spill]] }
 0x1df   : > { %v785_v35 = vmul.f32 %v3520_v22, %v2722_v33  ;;  %v698_v53 = vmul.f32 %v697_v54, %v2599_v62  ;;  %v676_v36 = vmul.f32 %v675_v11, %v2607_v61  ;;  %v684_v2 = vrot.slane %v680_v17, 1 }
 0x1e0   : > { %v727_v24 = vadd.f32 %v725_v46, %v709_v42  ;;  %v716_v21 = vmul.f32 %v715_v10, %v2643_v1  ;;  %v779_v41 = vadd.f32 %v775_v29, %v767_v4  ;;  %v694_v9 = vmul.f32 %v693_v38, %v2599_v62 }
 0x1e1   : > { %v702_v34 = vrot.slane %v698_v53, 1  ;;  %v752_v54 = vmul.f32 %v751_v20, %v2666_v50  ;;  %v688_v43 = vadd.f32 %v684_v2, %v676_v36  ;;  %v712_v11 = vmul.f32 %v711_v7, %v2643_v1 }
 0x1e2   : > { %v745_v30 = vadd.f32 %v2436_v39, %v727_v24  ;;  %v720_v10 = vrot.slane %v716_v21, 1  ;;  %v797_v28 = vadd.f32 %v793_v52, %v785_v35  ;;  %v770_v38 = vmul.f32 %v769_v27, %v2691_v44 }
 0x1e3   : > { %v706_v40 = vadd.f32 %v702_v34, %v694_v9  ;;  %v756_v16 = vrot.slane %v752_v54, 1  ;;  %v748_v39 = vmul.f32 %v747_v19, %v2666_v50  ;;  %v788_v20 = vmul.f32 %v787_v31, %v2718_v37 }
 0x1e4   : > { %v763_v5 = vadd.f32 %v761_v8, %v745_v30  ;;  %v724_v0 = vadd.f32 %v720_v10, %v712_v11  ;;  %v766_v46 = vmul.f32 %v765_v25, %v2691_v44  ;;  %v774_v29 = vrot.slane %v770_v38, 1 }
 0x1e5   : > { %v708_v7 = vadd.f32 %v706_v40, %v688_v43  ;;  %v3526_v63 = vstv %s3521_s29  ;;  %v3527_v4 = vmov %v3520_v22  ;;  %v3528_v8 = vstv %s3522_s6 }
 0x1e6   : > { %v829_v42 = vmul.f32 %v3526_v63, %v2611_v56  ;;  %v781_v27 = vadd.f32 %v779_v41, %v763_v5  ;;  %v784_v17 = vmul.f32 %v3527_v4, %v2718_v37  ;;  %v825_v19 = vmul.f32 %v3528_v8, %v2611_v56 }
 0x1e7   : > { %v3529_v22 = vstv %s3523_s25  ;;  %v726_v35 = vadd.f32 %v724_v0, %v708_v7  ;;  %v760_v52 = vadd.f32 %v756_v16, %v748_v39  ;;  %v792_v25 = vrot.slane %v788_v20, 1 }
 0x1e8   : > { %v847_v31 = vmul.f32 %v3529_v22, %v2603_v59  ;;  %v833_v53 = vrot.slane %v829_v42, 1  ;;  %v799_v24 = vadd.f32 %v797_v28, %v781_v27  ;;  %v3531_v36 = vstv %s3524_s12 }
 0x1e9   : > { %v843_v2 = vmul.f32 %v3531_v36, %v2603_v59  ;;  %v3532_v41 = vstv %s3525_s3  ;;  %v744_v34 = vadd.f32 %v2450_v45, %v726_v35  ;;  %v778_v54 = vadd.f32 %v774_v29, %v766_v46 }
 0x1ea   : > { %v851_v21 = vrot.slane %v847_v31, 1  ;;  %v865_v9 = vmul.f32 %v3532_v41, %v2647_v3  ;;  %v837_v30 = vadd.f32 %v833_v53, %v825_v19  ;;  %v3534_v43 = vstv %s2380_s17  ;;  %801 = vrot.lane.b32.xlu0 %v799_v24, %s2054_s0 }
 0x1eb   : > { %v901_v11 = vmul.f32 %v3534_v43, %v2670_v58  ;;  %v3536_v28 = vstv %s3530_s9  ;;  %v3537_v38 = vstv %s2390_s24  ;;  %v762_v45 = vadd.f32 %v760_v52, %v744_v34 }
 0x1ec   : > { %v855_v10 = vadd.f32 %v851_v21, %v843_v2  ;;  %v861_v40 = vmul.f32 %v3536_v28, %v2647_v3  ;;  %v869_v16 = vrot.slane %v865_v9, 1  ;;  %v919_v5 = vmul.f32 %v3537_v38, %v2695_v32 }
 0x1ed   : > { %v796_v0 = vadd.f32 %v792_v25, %v784_v17  ;;  %v905_v39 = vrot.slane %v901_v11, 1  ;;  %v3538_v20 = vstv %s2409_s13  ;;  %v3539_v63 = vstv %s3533_s30  ;;  %s1746_s30 = sld [smem:[#allocation8 + $0x95]] }
 0x1ee   : > { %v937_v7 = vmul.f32 %v3538_v20, %v2722_v33  ;;  %v857_v46 = vadd.f32 %v855_v10, %v837_v30  ;;  %v873_v29 = vadd.f32 %v869_v16, %v861_v40  ;;  %v897_v42 = vmul.f32 %v3539_v63, %v2670_v58 }
 0x1ef   : > { %v923_v27 = vrot.slane %v919_v5, 1  ;;  %v780_v4 = vadd.f32 %v778_v54, %v762_v45  ;;  %v3540_v8 = vstv %s3535_s8  ;;  %v3541_v17 = vstv %s3521_s29  ;;  %s3625_s29 = sld [smem:[#allocation60_spill]] }
 0x1f0   : > { %v915_v19 = vmul.f32 %v3540_v8, %v2695_v32  ;;  %v941_v22 = vrot.slane %v937_v7, 1  ;;  %v828_v31 = vmul.f32 %v3541_v17, %v2607_v61  ;;  %v875_v35 = vadd.f32 %v873_v29, %v857_v46 }
 0x1f1   : > { %v909_v52 = vadd.f32 %v905_v39, %v897_v42  ;;  %v3542_v25 = vstv %s3473_s21  ;;  %v3543_v24 = vstv %s3523_s25  ;;  %v798_v2 = vadd.f32 %v796_v0, %v780_v4  ;;  %s3627_s25 = sld [smem:[#allocation66_spill]] }
 0x1f2   : > { %v933_v53 = vmul.f32 %v3542_v25, %v2722_v33  ;;  %v846_v36 = vmul.f32 %v3543_v24, %v2599_v62  ;;  %v927_v21 = vadd.f32 %v923_v27, %v915_v19  ;;  %v3544_v41 = vstv %s3522_s6  ;;  %s2057_s6 = smov 96  }
 0x1f3   : > { %v824_v9 = vmul.f32 %v3544_v41, %v2607_v61  ;;  %v832_v34 = vrot.slane %v828_v31, 1  ;;  %v893_v54 = vadd.f32 %v2461_v55, %v875_v35  ;;  %v3545_v30 = vstv %s3524_s12  ;;  %805 = vrot.lane.b32.xlu1 %v798_v2, %s2054_s0  ;;  %s3629_s12 = sld [smem:[#allocation68_spill]] }
 0x1f4   : > { %v842_v43 = vmul.f32 %v3545_v30, %v2599_v62  ;;  %v850_v11 = vrot.slane %v846_v36, 1  ;;  %v3546_v10 = vstv %s3525_s3  ;;  %v945_v40 = vadd.f32 %v941_v22, %v933_v53  ;;  %s3637_s3 = sld [smem:[#allocation24_spill]]  ;;  %s3111_s0 = sld [smem:[#allocation8 + $0x97]] }
 0x1f5   : > { %v864_v28 = vmul.f32 %v3546_v10, %v2643_v1  ;;  %v836_v16 = vadd.f32 %v832_v34, %v824_v9  ;;  %v3547_v38 = vstv %s2380_s17  ;;  %v3548_v45 = vstv %s2390_s24  ;;  %s3553_s17 = sld [smem:[#allocation58_spill]]  ;;  %s3556_s24 = sld [smem:[#allocation65_spill]] }
 0x1f6   : > { %v900_v5 = vmul.f32 %v3547_v38, %v2666_v50  ;;  %v918_v0 = vmul.f32 %v3548_v45, %v2691_v44  ;;  %v911_v55 = vadd.f32 %v909_v52, %v893_v54  ;;  %v854_v39 = vadd.f32 %v850_v11, %v842_v43 }
 0x1f7   : > { %v3550_v20 = vstv %s3530_s9  ;;  %v868_v46 = vrot.slane %v864_v28, 1  ;;  %v3551_v29 = vmov %v3539_v63  ;;  %v3552_v4 = vstv %s2409_s13  ;;  %s3563_s13 = sld [smem:[#allocation64_spill]]  ;;  %s1752_s9 = sld [smem:[#allocation8 + $0x98]] }
 0x1f8   : > { %v860_v7 = vmul.f32 %v3550_v20, %v2643_v1  ;;  %v896_v63 = vmul.f32 %v3551_v29, %v2666_v50  ;;  %v904_v42 = vrot.slane %v900_v5, 1  ;;  %v922_v27 = vrot.slane %v918_v0, 1 }
 0x1f9   : > { %v936_v8 = vmul.f32 %v3552_v4, %v2718_v37  ;;  %v929_v19 = vadd.f32 %v927_v21, %v911_v55  ;;  %v856_v22 = vadd.f32 %v854_v39, %v836_v16  ;;  %v3554_v31 = vstv %s2396_s22 }
 0x1fa   : > { %v872_v17 = vadd.f32 %v868_v46, %v860_v7  ;;  %v1112_v35 = vmul.f32 %v3554_v31, %v2607_v61  ;;  %v908_v52 = vadd.f32 %v904_v42, %v896_v63  ;;  %v3555_v25 = vstv %s3535_s8  ;;  %s1748_s8 = sld [smem:[#allocation8 + $0x96]] }
 0x1fb   : > { %v914_v53 = vmul.f32 %v3555_v25, %v2691_v44  ;;  %v940_v24 = vrot.slane %v936_v8, 1  ;;  %v3557_v36 = vstv %s3549_s15  ;;  %v947_v41 = vadd.f32 %v945_v40, %v929_v19 }
 0x1fc   : > { %v1108_v2 = vmul.f32 %v3557_v36, %v2607_v61  ;;  %v874_v9 = vadd.f32 %v872_v17, %v856_v22  ;;  %v1116_v34 = vrot.slane %v1112_v35, 1  ;;  %v3559_v21 = vstv %s3474_s23 }
 0x1fd   : > { %v1130_v54 = vmul.f32 %v3559_v21, %v2599_v62  ;;  %v926_v30 = vadd.f32 %v922_v27, %v914_v53  ;;  %v3560_v43 = vstv %s3473_s21  ;;  %v3561_v10 = vstv %s3553_s17  ;;  %949 = vrot.lane.b32.xlu0 %v947_v41, %s2055_s26  ;;  %s3577_s21 = sld [smem:[#allocation63_spill]] }
 0x1fe   : > { %v932_v11 = vmul.f32 %v3560_v43, %v2718_v37  ;;  %v1126_v28 = vmul.f32 %v3561_v10, %v2599_v62  ;;  %v3562_v16 = vstv %s3476_s28  ;;  %v892_v40 = vadd.f32 %v2467_v57, %v874_v9 }
 0x1ff   : > { %v1148_v38 = vmul.f32 %v3562_v16, %v2643_v1  ;;  %v1120_v5 = vadd.f32 %v1116_v34, %v1108_v2  ;;  %v1134_v45 = vrot.slane %v1130_v54, 1  ;;  %v3564_v0 = vstv %s3556_s24 }
 0x200   : > { %v1184_v55 = vmul.f32 %v3564_v0, %v2666_v50  ;;  %v944_v39 = vadd.f32 %v940_v24, %v932_v11  ;;  %v3565_v20 = vstv %s3558_s20  ;;  %v3566_v29 = vstv %s3482_s14  ;;  %s3585_s14 = sld [smem:[#allocation74_spill]] }
 0x201   : > { %v1144_v7 = vmul.f32 %v3565_v20, %v2643_v1  ;;  %v1152_v46 = vrot.slane %v1148_v38, 1  ;;  %v1202_v63 = vmul.f32 %v3566_v29, %v2691_v44  ;;  %v910_v42 = vadd.f32 %v908_v52, %v892_v40 }
 0x202   : > { %v1138_v27 = vadd.f32 %v1134_v45, %v1126_v28  ;;  %v1188_v57 = vrot.slane %v1184_v55, 1  ;;  %v3567_v4 = vstv %s2463_s18  ;;  %v3568_v22 = vstv %s3563_s13 }
 0x203   : > { %v1220_v8 = vmul.f32 %v3567_v4, %v2718_v37  ;;  %v1156_v19 = vadd.f32 %v1152_v46, %v1144_v7  ;;  %v1180_v17 = vmul.f32 %v3568_v22, %v2666_v50  ;;  %v1206_v31 = vrot.slane %v1202_v63, 1 }
 0x204   : > { %v3569_v35 = vstv %s2396_s22  ;;  %v928_v53 = vadd.f32 %v926_v30, %v910_v42  ;;  %v1140_v24 = vadd.f32 %v1138_v27, %v1120_v5  ;;  %v3570_v36 = vstv %s2438_s10  ;;  %s3588_s10 = sld [smem:[#allocation79_spill]]  ;;  %s3594_s22 = sld [smem:[#allocation77_spill]] }
 0x205   : > { %v1113_v25 = vmul.f32 %v3569_v35, %v2611_v56  ;;  %v1198_v52 = vmul.f32 %v3570_v36, %v2691_v44  ;;  %v1224_v2 = vrot.slane %v1220_v8, 1  ;;  %v3571_v41 = vstv %s2455_s11 }
 0x206   : > { %v1216_v9 = vmul.f32 %v3571_v41, %v2718_v37  ;;  %v3572_v34 = vstv %s3549_s15  ;;  %v3573_v43 = vstv %s3474_s23  ;;  %v946_v10 = vadd.f32 %v944_v39, %v928_v53  ;;  %s3608_s23 = sld [smem:[#allocation71_spill]]  ;;  %s3113_s15 = sld [smem:[#allocation8 + $0x18]] }
 0x207   : > { %v1109_v21 = vmul.f32 %v3572_v34, %v2611_v56  ;;  %v1117_v54 = vrot.slane %v1113_v25, 1  ;;  %v1131_v11 = vmul.f32 %v3573_v43, %v2603_v59  ;;  %v1158_v30 = vadd.f32 %v1156_v19, %v1140_v24 }
 0x208   : > { %v1192_v28 = vadd.f32 %v1188_v57, %v1180_v17  ;;  %v1210_v16 = vadd.f32 %v1206_v31, %v1198_v52  ;;  %v3574_v40 = vstv %s3553_s17  ;;  %v3575_v0 = vstv %s3476_s28  ;;  %953 = vrot.lane.b32.xlu1 %v946_v10, %s2055_s26  ;;  %s2056_s28 = smov 112   ;;  %s3115_s17 = sld [smem:[#allocation8 + $0x15]] }
 0x209   : > { %v1121_v38 = vadd.f32 %v1117_v54, %v1109_v21  ;;  %v1127_v5 = vmul.f32 %v3574_v40, %v2603_v59  ;;  %v1135_v45 = vrot.slane %v1131_v11, 1  ;;  %v1149_v55 = vmul.f32 %v3575_v0, %v2647_v3  ;;  %s3125_s26 = sld [smem:[#allocation8 + $0x9a]] }
 0x20a   : > { %v1176_v20 = vadd.f32 %v2484_v13, %v1158_v30  ;;  %v1228_v39 = vadd.f32 %v1224_v2, %v1216_v9  ;;  %v3576_v7 = vstv %s3556_s24  ;;  %v1203_v63 = vmul.f32 %v3566_v29, %v2695_v32  ;;  %s3117_s24 = sld [smem:[#allocation8 + $0x16]] }
 0x20b   : > { %v1185_v46 = vmul.f32 %v3576_v7, %v2670_v58  ;;  %v1139_v42 = vadd.f32 %v1135_v45, %v1127_v5  ;;  %v3578_v27 = vstv %s3558_s20  ;;  %v1153_v4 = vrot.slane %v1149_v55, 1  ;;  %s3119_s20 = sld [smem:[#allocation8 + $0x17]] }
 0x20c   : > { %v1145_v57 = vmul.f32 %v3578_v27, %v2647_v3  ;;  %v3579_v8 = vstv %s2463_s18  ;;  %v1194_v22 = vadd.f32 %v1192_v28, %v1176_v20  ;;  %v3580_v13 = vstv %s3563_s13  ;;  %s3592_s18 = sld [smem:[#allocation73_spill]]  ;;  %s3121_s13 = sld [smem:[#allocation8 + $0x99]] }
 0x20d   : > { %v1221_v19 = vmul.f32 %v3579_v8, %v2722_v33  ;;  %v1181_v17 = vmul.f32 %v3580_v13, %v2670_v58  ;;  %v1189_v31 = vrot.slane %v1185_v46, 1  ;;  %v1207_v35 = vrot.slane %v1203_v63, 1 }
 0x20e   : > { %v1141_v25 = vadd.f32 %v1139_v42, %v1121_v38  ;;  %v1157_v53 = vadd.f32 %v1153_v4, %v1145_v57  ;;  %v3581_v24 = vmov %v3570_v36  ;;  %v3582_v52 = vstv %s3483_s2  ;;  %s3605_s2 = sld [smem:[#allocation75_spill]] }
 0x20f   : > { %v1199_v36 = vmul.f32 %v3581_v24, %v2695_v32  ;;  %v1260_v2 = vmul.f32 %v3582_v52, %v2607_v61  ;;  %v1212_v41 = vadd.f32 %v1210_v16, %v1194_v22  ;;  %v3583_v9 = vstv %s2455_s11  ;;  %s3590_s11 = sld [smem:[#allocation72_spill]] }
 0x210   : > { %v1217_v34 = vmul.f32 %v3583_v9, %v2722_v33  ;;  %v1225_v21 = vrot.slane %v1221_v19, 1  ;;  %v3584_v54 = vstv %s3577_s21  ;;  %v1159_v11 = vadd.f32 %v1157_v53, %v1141_v25 }
 0x211   : > { %v1256_v43 = vmul.f32 %v3584_v54, %v2607_v61  ;;  %v1193_v10 = vadd.f32 %v1189_v31, %v1181_v17  ;;  %v1264_v30 = vrot.slane %v1260_v2, 1  ;;  %v3586_v28 = vstv %s3487_s7  ;;  %s3614_s7 = sld [smem:[#allocation59_spill]] }
 0x212   : > { %v1278_v38 = vmul.f32 %v3586_v28, %v2599_v62  ;;  %v1230_v40 = vadd.f32 %v1228_v39, %v1212_v41  ;;  %v1211_v5 = vadd.f32 %v1207_v35, %v1199_v36  ;;  %v3587_v45 = vstv %s3485_s27 }
 0x213   : > { %v1274_v16 = vmul.f32 %v3587_v45, %v2599_v62  ;;  %v3589_v0 = vstv %s3488_s16  ;;  %v1177_v20 = vadd.f32 %v2493_v14, %v1159_v11  ;;  %v1268_v7 = vadd.f32 %v1264_v30, %v1256_v43 }
 0x214   : > { %v1296_v55 = vmul.f32 %v3589_v0, %v2643_v1  ;;  %v1282_v46 = vrot.slane %v1278_v38, 1  ;;  %v3591_v29 = vstv %s2488_s1  ;;  %1234 = vrot.lane.b32.xlu0 %v1230_v40, %s2056_s28  ;;  %v1229_v39 = vadd.f32 %v1225_v21, %v1217_v34 }
 0x215   : > { %v1332_v63 = vmul.f32 %v3591_v29, %v2666_v50  ;;  %v3593_v42 = vstv %s2465_s5  ;;  %v3595_v4 = vstv %s3585_s14  ;;  %v1195_v14 = vadd.f32 %v1193_v10, %v1177_v20  ;;  %s3135_s14 = sld [smem:[#allocation8 + $0x1a]] }
 0x216   : > { %v1292_v27 = vmul.f32 %v3593_v42, %v2643_v1  ;;  %v1300_v57 = vrot.slane %v1296_v55, 1  ;;  %v1350_v8 = vmul.f32 %v3595_v4, %v2691_v44  ;;  %v1286_v19 = vadd.f32 %v1282_v46, %v1274_v16 }
 0x217   : > { %v1336_v22 = vrot.slane %v1332_v63, 1  ;;  %v3596_v13 = vstv %s3588_s10  ;;  %v3597_v35 = vstv %s3590_s11  ;;  %v3598_v24 = vmov %v3582_v52  ;;  %s3137_s10 = sld [smem:[#allocation8 + $0x1b]] }
 0x218   : > { %v1368_v17 = vmul.f32 %v3596_v13, %v2718_v37  ;;  %v1304_v31 = vadd.f32 %v1300_v57, %v1292_v27  ;;  %v1328_v25 = vmul.f32 %v3597_v35, %v2666_v50  ;;  %v1354_v53 = vrot.slane %v1350_v8, 1  ;;  %s3148_s11 = sld [smem:[#allocation8 + $0x9b]] }
 0x219   : > { %v1261_v36 = vmul.f32 %v3598_v24, %v2611_v56  ;;  %v1213_v52 = vadd.f32 %v1211_v5, %v1195_v14  ;;  %v1288_v2 = vadd.f32 %v1286_v19, %v1268_v7  ;;  %v3599_v41 = vstv %s3592_s18  ;;  %s3646_s18 = sld [smem:[#allocation16_spill]] }
 0x21a   : > { %v1346_v9 = vmul.f32 %v3599_v41, %v2691_v44  ;;  %v1372_v34 = vrot.slane %v1368_v17, 1  ;;  %v3600_v21 = vstv %s3594_s22  ;;  %v3601_v43 = vstv %s3577_s21  ;;  %s3129_s21 = sld [smem:[#allocation8 + $0x19]] }
 0x21b   : > { %v1364_v54 = vmul.f32 %v3600_v21, %v2718_v37  ;;  %v1257_v11 = vmul.f32 %v3601_v43, %v2611_v56  ;;  %v1265_v10 = vrot.slane %v1261_v36, 1  ;;  %v3602_v30 = vmov %v3586_v28  ;;  %s3647_s22 = sld [smem:[#allocation21_spill]] }
 0x21c   : > { %v1279_v28 = vmul.f32 %v3602_v30, %v2603_v59  ;;  %v1231_v38 = vadd.f32 %v1229_v39, %v1213_v52  ;;  %v1306_v40 = vadd.f32 %v1304_v31, %v1288_v2  ;;  %v1340_v5 = vadd.f32 %v1336_v22, %v1328_v25 }
 0x21d   : > { %v1358_v45 = vadd.f32 %v1354_v53, %v1346_v9  ;;  %v1269_v16 = vadd.f32 %v1265_v10, %v1257_v11  ;;  %v3603_v0 = vstv %s3485_s27  ;;  %v3604_v7 = vstv %s3488_s16  ;;  %s3611_s16 = sld [smem:[#allocation78_spill]]  ;;  %s3620_s27 = sld [smem:[#allocation80_spill]] }
 0x21e   : > { %v1275_v55 = vmul.f32 %v3603_v0, %v2603_v59  ;;  %v1283_v20 = vrot.slane %v1279_v28, 1  ;;  %v1297_v46 = vmul.f32 %v3604_v7, %v2647_v3  ;;  %1236 = vrot.lane.b32.xlu1 %v1231_v38, %s2056_s28  ;;  %v1324_v29 = vadd.f32 %v2495_v60, %v1306_v40  ;;  %s3645_s28 = sld [smem:[#allocation23_spill]] }
 0x21f   : > { %v1376_v63 = vadd.f32 %v1372_v34, %v1364_v54  ;;  %v3606_v39 = vstv %s2488_s1  ;;  %v3607_v27 = vmov %v3595_v4  ;;  %v3609_v8 = vstv %s2465_s5  ;;  %s3613_s1 = sld [smem:[#allocation76_spill]]  ;;  %s3617_s5 = sld [smem:[#allocation62_spill]] }
 0x220   : > { %v1333_v42 = vmul.f32 %v3606_v39, %v2670_v58  ;;  %v1351_v57 = vmul.f32 %v3607_v27, %v2695_v32  ;;  %v1287_v4 = vadd.f32 %v1283_v20, %v1275_v55  ;;  %v1293_v14 = vmul.f32 %v3609_v8, %v2647_v3 }
 0x221   : > { %v1301_v19 = vrot.slane %v1297_v46, 1  ;;  %v3610_v22 = vmov %v3596_v13  ;;  %v1342_v17 = vadd.f32 %v1340_v5, %v1324_v29  ;;  %v3612_v60 = vmov %v3597_v35  ;;  %p3649_p2 = scmp.ne.s32.totalorder %s3647_s22, 0 }
 0x222   : > { %v1369_v13 = vmul.f32 %v3610_v22, %v2722_v33  ;;  %v1329_v31 = vmul.f32 %v3612_v60, %v2670_v58  ;;  %v1337_v35 = vrot.slane %v1333_v42, 1  ;;  %v1355_v25 = vrot.slane %v1351_v57, 1 }
 0x223   : > { %v1289_v53 = vadd.f32 %v1287_v4, %v1269_v16  ;;  %v1305_v24 = vadd.f32 %v1301_v19, %v1293_v14  ;;  %v3615_v36 = vmov %v3599_v41  ;;  %v3616_v2 = vstv %s3605_s2 }
 0x224   : > { %v1347_v52 = vmul.f32 %v3615_v36, %v2695_v32  ;;  %v1408_v41 = vmul.f32 %v3616_v2, %v2607_v61  ;;  %v1360_v9 = vadd.f32 %v1358_v45, %v1342_v17  ;;  %v3618_v34 = vmov %v3600_v21  ;;  %s1700_s2 = sshll.u32 %s3645_s28, 1 }
 0x225   : > { %v1365_v21 = vmul.f32 %v3618_v34, %v2722_v33  ;;  %v1373_v54 = vrot.slane %v1369_v13, 1  ;;  %v3619_v43 = vstv %s3608_s23  ;;  %v1307_v10 = vadd.f32 %v1305_v24, %v1289_v53  ;;  %s1809_s23 = sshll.u32 %s3646_s18, 5 }
 0x226   : > { %v1404_v11 = vmul.f32 %v3619_v43, %v2607_v61  ;;  %v1341_v30 = vadd.f32 %v1337_v35, %v1329_v31  ;;  %v1412_v28 = vrot.slane %v1408_v41, 1  ;;  %v3622_v38 = vstv %s3611_s16  ;;  %s189_s16 = scalar_lea.vmem [#allocation9], %s1700_s2 }
 0x227   : > { %v1426_v40 = vmul.f32 %v3622_v38, %v2599_v62  ;;  %v1378_v5 = vadd.f32 %v1376_v63, %v1360_v9  ;;  %v1359_v16 = vadd.f32 %v1355_v25, %v1347_v52  ;;  %v3623_v0 = vstv %s3613_s1  ;;  %s1596_s1 = sshll.u32 %s189_s16, 4  ;;  %s3210_s1 = int_to_ptr.vmem [resolvable:$true] %s1596_s1 }
 0x228   : > { %v1422_v45 = vmul.f32 %v3623_v0, %v2599_v62  ;;  %v3624_v55 = vstv %s3614_s7  ;;  %v1325_v7 = vadd.f32 %v2501_v15, %v1307_v10  ;;  %v1416_v46 = vadd.f32 %v1412_v28, %v1404_v11 }
 0x229   : > { %v1444_v20 = vmul.f32 %v3624_v55, %v2643_v1  ;;  %v1430_v29 = vrot.slane %v1426_v40, 1  ;;  %v3626_v39 = vstv %s3617_s5  ;;  %1382 = vrot.lane.b32.xlu0 %v1378_v5, %s2057_s6  ;;  %v1377_v63 = vadd.f32 %v1373_v54, %v1365_v21 }
 0x22a   : > { %v1480_v42 = vmul.f32 %v3626_v39, %v2666_v50  ;;  %v3628_v27 = vstv %s3620_s27  ;;  %v3630_v8 = vstv %s3621_s4  ;;  %v1343_v15 = vadd.f32 %v1341_v30, %v1325_v7  ;;  %s3648_s27 = sld [smem:[#allocation83_spill]] }
 0x22b   : > { %v1440_v57 = vmul.f32 %v3628_v27, %v2643_v1  ;;  %v1448_v4 = vrot.slane %v1444_v20, 1  ;;  %v1498_v14 = vmul.f32 %v3630_v8, %v2691_v44  ;;  %v1434_v19 = vadd.f32 %v1430_v29, %v1422_v45 }
 0x22c   : > { %v1484_v22 = vrot.slane %v1480_v42, 1  ;;  %v1516_v13 = vmul.f32 %v1515_v12, %v2718_v37  ;;  %v3631_v60 = vstv %s3625_s29  ;;  %v3632_v35 = vmov %v3616_v2  ;;  %s1582_s29 = scalar_lea.sflag [#allocation6], %s3645_s28 }
 0x22d   : > { %v1452_v17 = vadd.f32 %v1448_v4, %v1440_v57  ;;  %v1476_v31 = vmul.f32 %v3631_v60, %v2666_v50  ;;  %v1409_v25 = vmul.f32 %v3632_v35, %v2611_v56  ;;  %v1467_v53 = vrot.slane %v2506_v18, 1 }
 0x22e   : > { %v1361_v24 = vadd.f32 %v1359_v16, %v1343_v15  ;;  %v1436_v36 = vadd.f32 %v1434_v19, %v1416_v46  ;;  %v3633_v52 = vstv %s3627_s25  ;;  %v1502_v41 = vrot.slane %v1498_v14, 1 }
 0x22f   : > { %v1494_v2 = vmul.f32 %v3633_v52, %v2691_v44  ;;  %v3634_v9 = vstv %s3629_s12  ;;  %v3635_v21 = vmov %v3619_v43  ;;  %v1413_v43 = vrot.slane %v1409_v25, 1 }
 0x230   : > { %v1512_v34 = vmul.f32 %v3634_v9, %v2718_v37  ;;  %v1405_v54 = vmul.f32 %v3635_v21, %v2611_v56  ;;  %v3636_v11 = vmov %v3622_v38  ;;  %v1379_v10 = vadd.f32 %v1377_v63, %v1361_v24  ;;  %s3208_s4 = scalar_lea.hbm %s3648_s27, %s1809_s23 }
 0x231   : > { %v1427_v18 = vmul.f32 %v3636_v11, %v2603_v59  ;;  %v1454_v30 = vadd.f32 %v1452_v17, %v1436_v36  ;;  %v1488_v28 = vadd.f32 %v1484_v22, %v1476_v31  ;;  %v1520_v38 = vrot.slane %v1516_v13, 1 }
 0x232   : > { %v1417_v40 = vadd.f32 %v1413_v43, %v1405_v54  ;;  %v3638_v5 = vmov %v3623_v0  ;;  %v3639_v45 = vmov %v3624_v55  ;;  %1384 = vrot.lane.b32.xlu1 %v1379_v10, %s2057_s6  ;;  %v1506_v7 = vadd.f32 %v1502_v41, %v1494_v2  ;;  %s1953_s6 = scalar_lea.vmem %s3210_s1, 32 }
 0x233   : > { %v1423_v16 = vmul.f32 %v3638_v5, %v2603_v59  ;;  %v1431_v0 = vrot.slane %v1427_v18, 1  ;;  %v1445_v55 = vmul.f32 %v3639_v45, %v2647_v3  ;;  %v1472_v20 = vadd.f32 %v2515_v23, %v1454_v30  ;;  %p1954_p8 = scmp.ne.s32.totalorder %s3210_s1, %s1953_s6 }
 0x234   : > { %v3640_v46 = vmov %v3626_v39  ;;  %v3641_v39 = vmov %v3630_v8  ;;  %v1441_v57 = vmul.f32 %v3628_v27, %v2647_v3  ;;  %v1517_v8 = vmul.f32 %v1515_v12, %v2722_v33 }
 0x235   : > { %v1481_v29 = vmul.f32 %v3640_v46, %v2670_v58  ;;  %v1499_v42 = vmul.f32 %v3641_v39, %v2695_v32  ;;  %v1435_v63 = vadd.f32 %v1431_v0, %v1423_v16  ;;  %v1449_v4 = vrot.slane %v1445_v55, 1  ;;  %p1955_p12 = pnand %p1954_p8, %p3649_p2 }
 0x236   : > { %v1490_v14 = vadd.f32 %v1488_v28, %v1472_v20  ;;  %v1524_v15 = vadd.f32 %v1520_v38, %v1512_v34  ;;  %v3642_v23 = vstv %s3637_s3  ;;  %v1477_v31 = vmul.f32 %v3631_v60, %v2670_v58 }
 0x237   : > { %v1459_v19 = vmul.f32 %v3642_v23, %v2245_v47  ;;  %v1485_v22 = vrot.slane %v1481_v29, 1  ;;  %v1437_v13 = vadd.f32 %v1435_v63, %v1417_v40  ;;  %v1453_v17 = vadd.f32 %v1449_v4, %v1441_v57  ;;  %p1956_p5 = pneg %p1955_p12 }
 0x238   : > { %v1503_v35 = vrot.slane %v1499_v42, 1  ;;  %v1508_v25 = vadd.f32 %v1506_v7, %v1490_v14  ;;  %v3643_v2 = vstv %s3627_s25  ;;  %v1521_v41 = vrot.slane %v1517_v8, 1  ;;  %s2059_s25 = smov [#allocation9]  }
 0x239   : > { %v1471_v24 = vadd.f32 %v1467_v53, %v1459_v19  ;;  %v1455_v36 = vadd.f32 %v1453_v17, %v1437_v13  ;;  %v1489_v52 = vadd.f32 %v1485_v22, %v1477_v31  ;;  %v1495_v12 = vmul.f32 %v3643_v2, %v2695_v32 }
 0x23a   : > { %v1526_v9 = vadd.f32 %v1524_v15, %v1508_v25  ;;  %v3644_v54 = vstv %s3629_s12  ;;  %v1029_v53 = vstv %s1752_s9  ;;  %v975_v28 = vstv %s1746_s30  ;;  %s1957_s12 = sshll.u32 %s2059_s25, 4  ;;  %s1958_s12 = int_to_ptr.vmem [resolvable:$false] %s1957_s12 }
 0x23b   : > { %v1473_v34 = vadd.f32 %v1471_v24, %v1455_v36  ;;  %v1507_v21 = vadd.f32 %v1503_v35, %v1495_v12  ;;  %v1513_v43 = vmul.f32 %v3644_v54, %v2722_v33  ;;  %v993_v38 = vstv %s1748_s8  ;;  %s1959_s3 = scalar_lea.vmem %s1958_s12, 64  ;;  %p1960_p4 = scmp.lt.s32.totalorder %s3210_s1, %s1958_s12 }
 0x23c   : > { %1530 = vrot.lane.b32.xlu0 %v1526_v9, %s2058_s19  ;;  %v1030_v40 = vmul.f32 %v1029_v53, %v2249_v48  ;;  %v1011_v5 = vstv %s3111_s0  ;;  %v976_v16 = vmul.f32 %v975_v28, %v2607_v61  ;;  %v994_v0 = vmul.f32 %v993_v38, %v2599_v62  ;;  %p1961_p9 = scmp.lt.s32.totalorder %s1959_s3, %s1953_s6 }
 0x23d   : > { %v1491_v11 = vadd.f32 %v1489_v52, %v1473_v34  ;;  %v1525_v18 = vadd.f32 %v1521_v41, %v1513_v43  ;;  %v1025_v45 = vstv %s3113_s15  ;;  %v3133_v55 = vmul.f32 %v1029_v53, %v2245_v47 }
 0x23e   : > { %v1012_v20 = vmul.f32 %v1011_v5, %v2643_v1  ;;  %v1034_v7 = vrot.slane %v1030_v40, 1  ;;  %v971_v39 = vstv %s3115_s17  ;;  %v977_v42 = vmul.f32 %v975_v28, %v2611_v56  ;;  %p1962_p13 = por %p1961_p9, %p1960_p4 }
 0x23f   : > { %v1509_v10 = vadd.f32 %v1507_v21, %v1491_v11  ;;  %v989_v63 = vstv %s3117_s24  ;;  %v995_v27 = vmul.f32 %v993_v38, %v2603_v59  ;;  %v980_v57 = vrot.slane %v976_v16, 1 }
 0x240   : > { %v998_v4 = vrot.slane %v994_v0, 1  ;;  %v1007_v8 = vstv %s3119_s20  ;;  %v1013_v14 = vmul.f32 %v1011_v5, %v2647_v3  ;;  %v1027_v15 = vmul.f32 %v1025_v45, %v2245_v47  ;;  %p1963_p11 = pnand %p1962_p13, %p1956_p5 }
 0x241   : > { %v1527_v30 = vadd.f32 %v1525_v18, %v1509_v10  ;;  %v1026_v23 = vmul.f32 %v1025_v45, %v2249_v48  ;;  %v1047_v19 = vstv %s3121_s13  ;;  %v972_v22 = vmul.f32 %v971_v39, %v2607_v61 }
 0x242   : > { %v990_v13 = vmul.f32 %v989_v63, %v2599_v62  ;;  %v1016_v17 = vrot.slane %v1012_v20, 1  ;;  %v981_v60 = vrot.slane %v977_v42, 1  ;;  %v999_v31 = vrot.slane %v995_v27, 1 }
 0x243   : > { %1532 = vrot.lane.b32.xlu1 %v1527_v30, %s2058_s19  ;;  %v1035_v35 = vrot.slane %v3133_v55, 1  ;;  %v1038_v25 = vadd.f32 %v1034_v7, %v1026_v23  ;;  %v1065_v24 = vstv %s3125_s26  ;;  %v984_v36 = vadd.f32 %v980_v57, %v972_v22 }
 0x244   : > { %v1002_v47 = vadd.f32 %v998_v4, %v990_v13  ;;  %v1008_v48 = vmul.f32 %v1007_v8, %v2643_v1  ;;  %v973_v61 = vmul.f32 %v971_v39, %v2611_v56  ;;  %v991_v62 = vmul.f32 %v989_v63, %v2603_v59 }
 0x245   : > { %v1017_v12 = vrot.slane %v1013_v14, 1  ;;  %v1048_v41 = vmul.f32 %v1047_v19, %v2666_v50  ;;  %v1043_v9 = vstv %s3129_s21  ;;  %v1061_v34 = vstv %s3135_s14 }
 0x246   : > { %v1079_v21 = vstv %s3137_s10  ;;  %v1020_v54 = vadd.f32 %v1016_v17, %v1008_v48  ;;  %v985_v43 = vadd.f32 %v981_v60, %v973_v61  ;;  %v1003_v11 = vadd.f32 %v999_v31, %v991_v62 }
 0x247   : > { %v1009_v18 = vmul.f32 %v1007_v8, %v2647_v3  ;;  %v1083_v10 = vstv %s3148_s11  ;;  %vm659_vm7 = vcmask 392192   ;;  %v1049_v1 = vmul.f32 %v1047_v19, %v2670_v58 }
 0x248   : > { %v1004_v30 = vadd.f32 %v1002_v47, %v984_v36  ;;  %v1066_v56 = vmul.f32 %v1065_v24, %v2691_v44  ;;  %vm664_vm8 = vcmp.ge.s32.totalorder %v2308_v49, 48  ;;  %vm807_vm9 = vcmask 261120  }
 0x249   : > { %v1021_v59 = vadd.f32 %v1017_v12, %v1009_v18  ;;  %v1052_v53 = vrot.slane %v1048_v41, 1  ;;  %vm812_vm10 = vcmp.ge.s32.totalorder %v2308_v49, 32  ;;  %vm955_vm11 = vcmask 130048  }
 0x24a   : > { %v1022_v28 = vadd.f32 %v1020_v54, %v1004_v30  ;;  %v1084_v38 = vmul.f32 %v1083_v10, %v2718_v37  ;;  %vm960_vm12 = vcmp.ge.s32.totalorder %v2308_v49, 16  ;;  %v1005_v3 = vadd.f32 %v1003_v11, %v985_v43 }
 0x24b   : > { %v1067_v5 = vmul.f32 %v1065_v24, %v2695_v32  ;;  %v1044_v0 = vmul.f32 %v1043_v9, %v2666_v50  ;;  %v1045_v55 = vmul.f32 %v1043_v9, %v2670_v58  ;;  %v1053_v20 = vrot.slane %v1049_v1, 1 }
 0x24c   : > { %v1070_v7 = vrot.slane %v1066_v56, 1  ;;  %v1023_v39 = vadd.f32 %v1021_v59, %v1005_v3  ;;  %v1085_v42 = vmul.f32 %v1083_v10, %v2722_v33  ;;  %v1062_v27 = vmul.f32 %v1061_v34, %v2691_v44 }
 0x24d   : > { %v1056_v63 = vadd.f32 %v1052_v53, %v1044_v0  ;;  %v1040_v8 = vadd.f32 %v1038_v25, %v1022_v28  ;;  %v1088_v50 = vrot.slane %v1084_v38, 1  ;;  %v1039_v58 = vadd.f32 %v1035_v35, %v1027_v15 }
 0x24e   : > { %v1071_v23 = vrot.slane %v1067_v5, 1  ;;  %v1057_v19 = vadd.f32 %v1053_v20, %v1045_v55  ;;  %v1063_v22 = vmul.f32 %v1061_v34, %v2695_v32  ;;  %v1074_v13 = vadd.f32 %v1070_v7, %v1062_v27 }
 0x24f   : > { %v3140_v46 = vpop.permute.xlu0 %653  ;;  %v1080_v17 = vmul.f32 %v1079_v21, %v2718_v37  ;;  %v1041_v60 = vadd.f32 %v1039_v58, %v1023_v39  ;;  %v1089_v31 = vrot.slane %v1085_v42, 1  ;;  %v1058_v15 = vadd.f32 %v1056_v63, %v1040_v8 }
 0x250   : > { %v3142_v29 = vpop.permute.xlu1 %657  ;;  %v1075_v61 = vadd.f32 %v1071_v23, %v1063_v22  ;;  %v1081_v32 = vmul.f32 %v1079_v21, %v2722_v33  ;;  %vm1238_vm13 = vcmask 916480   ;;  %vm1386_vm14 = vcmask 785408  }
 0x251   : > { %v663_v57 = vsel %vm659_vm7, %v3140_v46, %v3142_v29  ;;  %v1092_v35 = vadd.f32 %v1088_v50, %v1080_v17  ;;  %v660_v37 = vsel %vm659_vm7, %v3142_v29, %v3140_v46  ;;  %v1076_v41 = vadd.f32 %v1074_v13, %v1058_v15 }
 0x252   : > { %v670_v44 = vsel %vm664_vm8, %v663_v57, 0.0  ;;  %v1059_v9 = vadd.f32 %v1057_v19, %v1041_v60  ;;  %v1093_v34 = vadd.f32 %v1089_v31, %v1081_v32  ;;  %vm1247_vm15 = vcmp.lt.s32.totalorder %v2328_v51, 240 }
 0x253   : > { %vm1395_vm0 = vcmp.lt.s32.totalorder %v2328_v51, 224  ;;  %vm1534_vm2 = vcmask 654336   ;;  %vm1543_vm3 = vcmp.lt.s32.totalorder %v2328_v51, 208 }
 0x25c   : > { %v802_v52 = vpop.permute.xlu0 %801 }
 0x265   : > { %v806_v2 = vpop.permute.xlu1 %805 }
 0x266   : > { %v811_v45 = vsel %vm807_vm9, %v802_v52, %v806_v2  ;;  %v808_v24 = vsel %vm807_vm9, %v806_v2, %v802_v52  ;;  %v1094_v52 = vadd.f32 %v1092_v35, %v1076_v41  ;;  %v1077_v2 = vadd.f32 %v1075_v61, %v1059_v9 }
 0x267   : > { %v818_v14 = vsel %vm812_vm10, %v811_v45, 0.0  ;;  %v821_v49 = vadd.f32 %v808_v24, %v660_v37 }
 0x268   : > { %v820_v36 = vadd.f32 %v818_v14, %v670_v44  ;;  %v1095_v33 = vadd.f32 %v1093_v34, %v1077_v2 }
 0x26f   : > { %v950_v40 = vpop.permute.xlu0 %949 }
 0x27a   : > { %v954_v16 = vpop.permute.xlu1 %953 }
 0x27b   : > { %v959_v4 = vsel %vm955_vm11, %v950_v40, %v954_v16  ;;  %v956_v62 = vsel %vm955_vm11, %v954_v16, %v950_v40 }
 0x27c   : > { %v966_v25 = vsel %vm960_vm12, %v959_v4, 0.0  ;;  %v969_v54 = vadd.f32 %v956_v62, %v821_v49 }
 0x27d   : > { %v968_v12 = vadd.f32 %v966_v25, %v820_v36 }
 0x27e   : > { %v1105_v29 = vadd.f32 %v1095_v33, %v969_v54 }
 0x27f   : > { %v1104_v43 = vadd.f32 %v1094_v52, %v968_v12 }
 0x286   : > { %v1235_v47 = vpop.permute.xlu0 %1234 }
 0x290   : > { %v1237_v48 = vpop.permute.xlu1 %1236 }
 0x291   : > { %v1239_v21 = vsel %vm1238_vm13, %v1235_v47, %v1237_v48  ;;  %v1243_v46 = vsel %vm1238_vm13, %v1237_v48, %v1235_v47 }
 0x292   : > { %v1251_v1 = vsel %vm1247_vm15, %v1243_v46, 0.0  ;;  %v1252_v30 = vadd.f32 %v1239_v21, %v1104_v43 }
 0x293   : > { %v1253_v28 = vadd.f32 %v1251_v1, %v1105_v29 }
 0x29b   : > { %v1383_v11 = vpop.permute.xlu0 %1382 }
 0x2a4   : > { %v1385_v18 = vpop.permute.xlu1 %1384 }
 0x2a5   : > { %v1391_v10 = vsel %vm1386_vm14, %v1385_v18, %v1383_v11  ;;  %v1387_v56 = vsel %vm1386_vm14, %v1383_v11, %v1385_v18 }
 0x2a6   : > { %v1399_v59 = vsel %vm1395_vm0, %v1391_v10, 0.0  ;;  %v1400_v38 = vadd.f32 %v1387_v56, %v1252_v30 }
 0x2a7   : > { %v1401_v3 = vadd.f32 %v1399_v59, %v1253_v28 }
 0x2ae   : > { %v1531_v53 = vpop.permute.xlu0 %1530 }
 0x2b5   : > { %v1533_v40 = vpop.permute.xlu1 %1532 }
 0x2b6   : > { %v1535_v5 = vsel %vm1534_vm2, %v1531_v53, %v1533_v40  ;;  %v1539_v16 = vsel %vm1534_vm2, %v1533_v40, %v1531_v53 }
 0x2b7   : > { %v1547_v0 = vsel %vm1543_vm3, %v1539_v16, 0.0  ;;  %v1548_v45 = vadd.f32 %v1535_v5, %v1400_v38 }
 0x2b8   : > { %v1549_v55 = vadd.f32 %v1547_v0, %v1401_v3 }
 0x2b9   : > { %v1801_v20 = vmul.f32 -1.442695, %v1548_v45 }
 0x2ba   : > { %v1802_v7 = vmul.f32 -1.442695, %v1549_v55 }
 0x2bb   : > { %1900 = vpow2.f32 %v1801_v20 }
 0x2bc   : > { %1902 = vpow2.f32 %v1802_v7 }
 0x2c5   : > { %v1901_v39 = vpop.eup %1900 }
 0x2c6   : > { %v1903_v42 = vpop.eup %1902  ;;  %v1556_v63 = vadd.f32 1.0, %v1901_v39 }
 0x2c7   : > { %v1557_v27 = vadd.f32 1.0, %v1903_v42 }
 0x2c8   : > { %1904 = vrcp.f32 %v1556_v63 }
 0x2c9   : > { %1906 = vrcp.f32 %v1557_v27 }
 0x2d2   : > { %v1905_v51 = vpop.eup %1904 }
 0x2d3   : > { %v1907_v57 = vpop.eup %1906 }
 0x2d4   : > { %v1564_v4 = vcombine.low %v1905_v51, %v1907_v57 }
 0x2d6   : > { %v1571_v8 = vrot.slane %v1564_v4, %v2235_v26 }
 0x2d8   : > { %v1578_v50 = vrot.slane %v1571_v8, %v2235_v26 }
 0x2da   : > { %1580 = vst.msk [vmem:[%s189_s16] sm:$0x3] %vm2223_vm1, %v1578_v50 }
 0x2db   : > { %1966 = shalt.err (!%p1963_p11)
}
 0x2dc   : > { %s1967_s19 = scalar_lea.hbm %s3208_s4, 32  ;;  %s1971_s8 = scalar_lea.hbm %s3648_s27, 64 }
 0x2dd   : > { %p1968_p3 = scmp.ne.s32.totalorder %s3208_s4, %s1967_s19  ;;  %p1972_p6 = scmp.lt.u32.totalorder %s3208_s4, %s3648_s27 }
 0x2de   : > { %p1973_p1 = scmp.lt.u32.totalorder %s1971_s8, %s1967_s19  ;;  %p1975_p8 = scmp.lt.u32.totalorder %s1967_s19, %s3208_s4 }
 0x2df   : > { %p1969_p7 = pnand %p1968_p3, %p3649_p2 }
 0x2e0   : > { %p1974_p0 = por %p1973_p1, %p1972_p6 }
 0x2e1   : > { %p1970_p10 = pneg %p1969_p7 }
 0x2e2   : > { %p1976_p12 = por %p1975_p8, %p1974_p0 }
 0x2e4   : > { %p1977_p5 = pnand %p1976_p12, %p1970_p10 }
 0x2e6   : > { %1980 = shalt.err (!%p1977_p5)
}
 0x2e7   : > { %1816 = dma.vmem_to_hbm [thread:$0]  (%p3649_p2), %s3210_s1, 32, %s3208_s4, %s1582_s29  }
 0x2e8 PF: > { %s3650_s17 = sld [smem:[#allocation13_spill]]  ;;  %s3651_s24 = sld [smem:[#allocation19_spill]] }
 0x2e9   : > { %s3652_s20 = sld [smem:[#allocation18_spill]] }
 0x2ee   : > { %s1608_s13 = sand.u32 1, %s3650_s17   ;;  %p3653_p4 = scmp.ne.s32.totalorder %s3651_s24, 0 }
 0x2ef   : > { %p3654_p9 = scmp.ge.s32.totalorder %s3652_s20, 2  ;;  %s1609_s26 = scalar_lea.sflag [#allocation6], %s1608_s13 }
 0x2f1   : > { %p1827_p13 = pnand %p3654_p9, %p3653_p4 }
 0x2f3   : > { %2014 = dma.done.wait (!%p1827_p13), %s1609_s26, 32  }
 0x2f4   : > { %2016 = vsyncadd (!%p1827_p13), %s1609_s26, 4294967264  ;;  %s19_s14 = sadd.s32 1, %s3652_s20   ;;  %s3655_s9 = sld [smem:[#allocation14_spill]] }
 0x2f5   : > { %p16_p11 = scmp.ge.s32.totalorder %s19_s14, 4   ;;  %s3656_s10 = sld [smem:[#allocation15_spill]] }
 0x2f6   : > { %s3657_s11 = sld [smem:[#allocation22_spill]]  ;;  %s3658_s12 = sld [smem:[#allocation17_spill]] }
 0x2f7   : > { %s3659_s13 = sld [smem:[#allocation20_spill]]  ;;  %18 = sbr.rel (!%p16_p11) target bundleno = 11 (0xb), region = 86 }
 0x2fe   :  { %1614 = vsyncpa [#allocation5], 1 }
 0x2ff   :  { %1616 = vsyncpa [#allocation5 + $0x1], 1 }
 0x300   :  { %1617 = vsyncpa [#allocation6], 1 }
 0x301   :  { %1619 = vsyncpa [#allocation6 + $0x1], 1 }
 0x302   :  { %1620 = vsyncpa [#allocation7], 1 }
 0x303   :  { %1622 = vsyncpa [#allocation7 + $0x1], 1 }

</bundles_post_ra>
